<compile_context>
chip_gen: v5e
topology: v5e:2x2
jax: 0.10.0
libtpu: 0.0.40
codegen_flags: <defaults>
</compile_context>

<pallas_src>
import functools
import math

import jax
import jax.numpy as jnp
from jax import lax
from jax.experimental import pallas as pl
from jax.experimental.pallas import tpu as pltpu


_VMEM_LIMIT = 48 * 1024 * 1024      # stay well under v7x's 64 MiB physical VMEM
_VMEM_BUDGET = 24 * 1024 * 1024     # per-grid-step working-set target for tiling


# (Cin, Cout, fused-MaxPool2d(2,2)-after-this-conv) for the 13 convs.
_CONV_CFG = [
    # self.features
    (3, 64, False), (64, 64, True),
    (64, 128, False), (128, 128, True),
    (128, 256, False), (256, 256, False), (256, 256, True),
    (256, 512, False),
    # self.features_unfreeze
    (512, 512, False), (512, 512, True),
    (512, 512, False), (512, 512, False), (512, 512, False),
]


def _pick_tile_rows(H, W, Cin, Cout, pool, in_itemsize):
    """Largest row tile TH (divides H, even if pooling) whose working set fits."""
    cap = min(H, 64)
    for th in range(cap, 0, -1):
        if H % th:
            continue
        if pool and th % 2:
            continue
        need = ((th + 2) * W * Cin * in_itemsize            # halo'd input scratch
                + 2 * 9 * Cin * Cout * 2                    # bf16 weights (dbl buffered)
                + 2 * th * W * Cout * 2 // (4 if pool else 1)  # output blocks (bf16)
                + 3 * th * W * max(Cin, Cout) * 4)          # f32 accumulator + temps
        if need <= _VMEM_BUDGET:
            return th
    return 2 if pool else 1


# ----------------------------------------------------------------------------
# Kernel 1: 3x3 conv (stride 1, pad 1) + bias + ReLU (+ optional fused 2x2 pool)
# Row-tiled; the halo'd input tile is DMA'd manually from HBM (pl.ANY input),
# so the padded activation never round-trips through HBM.
# ----------------------------------------------------------------------------
def _conv3x3_kernel(x_hbm, w_ref, b_ref, o_ref, xpad, sem, *, tile_rows, pool):
    TH = tile_rows
    n = pl.program_id(0)
    t = pl.program_id(1)
    nT = pl.num_programs(1)
    H = x_hbm.shape[1]
    Cin = x_hbm.shape[3]
    W = xpad.shape[2]
    Cout = o_ref.shape[3]

    r0 = t * TH                                   # first input row of this tile

    # ---- stage the (TH+2, W, Cin) halo'd input tile in VMEM --------------
    main = pltpu.make_async_copy(
        x_hbm.at[pl.ds(n, 1), pl.ds(r0, TH), :, :],
        xpad.at[:, pl.ds(1, TH), :, :],
        sem.at[0])
    top = pltpu.make_async_copy(
        x_hbm.at[pl.ds(n, 1), pl.ds(jnp.maximum(r0 - 1, 0), 1), :, :],
        xpad.at[:, pl.ds(0, 1), :, :],
        sem.at[1])
    bot = pltpu.make_async_copy(
        x_hbm.at[pl.ds(n, 1), pl.ds(jnp.minimum(r0 + TH, H - 1), 1), :, :],
        xpad.at[:, pl.ds(TH + 1, 1), :, :],
        sem.at[2])

    main.start()

    @pl.when(t > 0)
    def _():
        top.start()

    @pl.when(t < nT - 1)
    def _():
        bot.start()

    # Zero-fill the top/bottom padding rows while the DMAs are in flight
    # (disjoint regions of the scratch).
    zrow = jnp.zeros((1, W, Cin), xpad.dtype)

    @pl.when(t == 0)
    def _():
        xpad[0, 0:1, :, :] = zrow

    @pl.when(t == nT - 1)
    def _():
        xpad[0, TH + 1:TH + 2, :, :] = zrow

    main.wait()

    @pl.when(t > 0)
    def _():
        top.wait()

    @pl.when(t < nT - 1)
    def _():
        bot.wait()

    # ---- 3x3 conv: 9 shifted (TH*W, Cin) x (Cin, Cout) MXU matmuls -------
    # bf16 operands feed the MXU; accumulation / bias / ReLU / pool are f32.
    acc = jnp.zeros((TH * W, Cout), jnp.float32)
    zcol = jnp.zeros((TH, 1, Cin), jnp.bfloat16)
    for ky in range(3):
        row = xpad[0, ky:ky + TH, :, :].astype(jnp.bfloat16)   # (TH, W, Cin)
        taps = (
            jnp.concatenate([zcol, row[:, :W - 1, :]], axis=1),  # kx = 0
            row,                                                 # kx = 1
            jnp.concatenate([row[:, 1:, :], zcol], axis=1),      # kx = 2
        )
        for kx, patch in enumerate(taps):
            acc = acc + jnp.dot(patch.reshape(TH * W, Cin),
                                w_ref[ky * 3 + kx],
                                preferred_element_type=jnp.float32)

    y = jnp.maximum(acc + b_ref[...], 0.0)                     # f32 bias + ReLU

    if pool:                                                   # fused MaxPool2d(2,2)
        yw = y.reshape(TH, W // 2, 2, Cout)
        yw = jnp.maximum(yw[:, :, 0, :], yw[:, :, 1, :])       # (TH, W/2, Cout)
        yh = yw.reshape(TH // 2, 2, W // 2, Cout)
        yp = jnp.maximum(yh[:, 0, :, :], yh[:, 1, :, :])       # (TH/2, W/2, Cout)
        o_ref[0] = yp.astype(o_ref.dtype)
    else:
        o_ref[0] = y.reshape(TH, W, Cout).astype(o_ref.dtype)


def conv3x3_relu(x, w, b, *, pool=False, tile_rows=None):
    """x: (N,H,W,Cin) f32/bf16, w: (3,3,Cin,Cout), b: (Cout,) -> (N,H',W',Cout) bf16."""
    N, H, W, Cin = x.shape
    Cout = w.shape[-1]
    if pool:
        # TODO(synk): PyTorch MaxPool2d(2,2) silently drops a trailing odd
        # row/col; the fused epilogue only supports even H, W.
        assert H % 2 == 0 and W % 2 == 0, "fused pool requires even H, W"
    if tile_rows is None:
        tile_rows = _pick_tile_rows(H, W, Cin, Cout, pool, x.dtype.itemsize)
    TH = tile_rows
    assert H % TH == 0 and (not pool or TH % 2 == 0), (H, TH, pool)
    nT = H // TH
    Ho, Wo = (H // 2, W // 2) if pool else (H, W)
    THo = TH // 2 if pool else TH

    w9 = w.astype(jnp.bfloat16).reshape(9, Cin, Cout)
    b2 = b.astype(jnp.float32).reshape(1, Cout)

    flops = 2 * N * H * W * 9 * Cin * Cout
    bytes_accessed = (x.size * x.dtype.itemsize + w9.size * 2 + b2.size * 4
                      + N * Ho * Wo * Cout * 2)

    kernel = functools.partial(_conv3x3_kernel, tile_rows=TH, pool=pool)
    return pl.pallas_call(
        kernel,
        out_shape=jax.ShapeDtypeStruct((N, Ho, Wo, Cout), jnp.bfloat16),
        grid=(N, nT),
        in_specs=[
            pl.BlockSpec(memory_space=pl.ANY),                     # raw HBM activations
            pl.BlockSpec((9, Cin, Cout), lambda n, t: (0, 0, 0)),  # weights: VMEM resident
            pl.BlockSpec((1, Cout), lambda n, t: (0, 0)),          # bias
        ],
        out_specs=pl.BlockSpec((1, THo, Wo, Cout), lambda n, t: (n, t, 0, 0)),
        scratch_shapes=[
            pltpu.VMEM((1, TH + 2, W, Cin), x.dtype),   # halo'd input tile
            pltpu.SemaphoreType.DMA((3,)),
        ],
        compiler_params=pltpu.CompilerParams(
            dimension_semantics=("parallel", "parallel"),
            vmem_limit_bytes=_VMEM_LIMIT),
        cost_estimate=pl.CostEstimate(flops=flops, transcendentals=0,
                                      bytes_accessed=bytes_accessed),
    )(x, w9, b2)


# ----------------------------------------------------------------------------
# Kernel 2: AdaptiveMaxPool2d((7,7)) -- PyTorch start/end index semantics.
# All 49 bins are reduced locally and written with a single lane-dense store.
# ----------------------------------------------------------------------------
def _adaptive_maxpool7_kernel(x_ref, o_ref):
    x = x_ref[0].astype(jnp.float32)                   # (H, W, C)
    H, W, C = x.shape
    rows = []
    for i in range(7):
        hs = (i * H) // 7
        he = -((-(i + 1) * H) // 7)                    # ceil((i+1)*H/7)
        cols = []
        for j in range(7):
            ws = (j * W) // 7
            we = -((-(j + 1) * W) // 7)
            cols.append(jnp.max(x[hs:he, ws:we, :], axis=(0, 1), keepdims=True))
        rows.append(jnp.concatenate(cols, axis=1))     # (1, 7, C)
    o_ref[0] = jnp.concatenate(rows, axis=0)           # single (7, 7, C) store


def adaptive_maxpool_7x7(x):
    N, H, W, C = x.shape
    return pl.pallas_call(
        _adaptive_maxpool7_kernel,
        out_shape=jax.ShapeDtypeStruct((N, 7, 7, C), jnp.float32),
        grid=(N,),
        in_specs=[pl.BlockSpec((1, H, W, C), lambda n: (n, 0, 0, 0))],
        out_specs=pl.BlockSpec((1, 7, 7, C), lambda n: (n, 0, 0, 0)),
        compiler_params=pltpu.CompilerParams(
            dimension_semantics=("parallel",),
            vmem_limit_bytes=_VMEM_LIMIT),
    )(x)


# ----------------------------------------------------------------------------
# Parameters (deterministic He-style init; weights bf16, biases f32).
# ----------------------------------------------------------------------------
def init_params(key):
    params = []
    keys = jax.random.split(key, len(_CONV_CFG))
    for k, (cin, cout, _) in zip(keys, _CONV_CFG):
        kw, kb = jax.random.split(k)
        std = math.sqrt(2.0 / (cin * 9))
        w = (jax.random.normal(kw, (3, 3, cin, cout), jnp.float32) * std
             ).astype(jnp.bfloat16)
        b = 0.01 * jax.random.normal(kb, (cout,), jnp.float32)
        params.append((w, b))
    return params


# ----------------------------------------------------------------------------
# Forward pass (mirrors fast_rcnn_net.forward).
# ----------------------------------------------------------------------------
def fast_rcnn_forward(params, x_nchw, region_projs=None):
    # region_projs is accepted but unused, exactly as in the PyTorch forward().
    x = jnp.transpose(x_nchw, (0, 2, 3, 1))            # NCHW -> NHWC (layout glue)
    for (w, b), (_, _, pool) in zip(params, _CONV_CFG):
        x = conv3x3_relu(x, w, b, pool=pool)           # bf16 activations between layers
    x = adaptive_maxpool_7x7(x)                        # (N, 7, 7, 512) f32
    # TODO(synk): self.classifier (Linear/Dropout) is defined in __init__ but
    # never invoked in forward(), so it is intentionally not executed here.
    return jnp.transpose(x, (0, 3, 1, 2))              # NHWC -> NCHW


# ----------------------------------------------------------------------------
# Pure-JAX references (same bf16-operand / f32-accumulate precision).
# ----------------------------------------------------------------------------
def _conv_ref_layer(x, w, b, pool):
    y = lax.conv_general_dilated(
        x.astype(jnp.bfloat16), w.astype(jnp.bfloat16),
        window_strides=(1, 1), padding=((1, 1), (1, 1)),
        dimension_numbers=("NHWC", "HWIO", "NHWC"),
        preferred_element_type=jnp.float32)
    y = jnp.maximum(y + b.astype(jnp.float32), 0.0)
    if pool:
        y = lax.reduce_window(y, -jnp.inf, lax.max,
                              (1, 2, 2, 1), (1, 2, 2, 1), "VALID")
    return y                                           # f32


def _adaptive_pool_ref(x):                             # x: (N, H, W, C) f32
    N, H, W, C = x.shape
    rows = []
    for i in range(7):
        hs, he = (i * H) // 7, -((-(i + 1) * H) // 7)
        cols = []
        for j in range(7):
            ws, we = (j * W) // 7, -((-(j + 1) * W) // 7)
            cols.append(jnp.max(x[:, hs:he, ws:we, :], axis=(1, 2), keepdims=True))
        rows.append(jnp.concatenate(cols, axis=2))
    return jnp.concatenate(rows, axis=1)


def _forward_ref(params, x_nchw):
    x = jnp.transpose(x_nchw, (0, 2, 3, 1))
    for (w, b), (_, _, pool) in zip(params, _CONV_CFG):
        x = _conv_ref_layer(x, w, b, pool).astype(jnp.bfloat16)
    x = _adaptive_pool_ref(x.astype(jnp.float32))
    return jnp.transpose(x, (0, 3, 1, 2))


if __name__ == "__main__":
    key = jax.random.PRNGKey(0)
    k_x, k_r, k_p, k_t = jax.random.split(key, 4)

    # --- unit check: row-tiled conv with halo DMAs (+ fused pool) vs lax ----
    kx1, kw1, kb1 = jax.random.split(k_t, 3)
    xt = jax.random.normal(kx1, (1, 16, 16, 128), jnp.float32).astype(jnp.bfloat16)
    wt = (0.05 * jax.random.normal(kw1, (3, 3, 128, 128), jnp.float32)
          ).astype(jnp.bfloat16)
    bt = 0.1 * jax.random.normal(kb1, (128,), jnp.float32)
    for pool in (False, True):
        y_k = conv3x3_relu(xt, wt, bt, pool=pool, tile_rows=4)   # 4 row tiles
        y_r = _conv_ref_layer(xt, wt, bt, pool)
        assert bool(jnp.allclose(y_k.astype(jnp.float32), y_r,
                                 rtol=2e-2, atol=2e-2)), ("conv mismatch", pool)

    # --- unit check: adaptive max-pool vs reference -------------------------
    xa = jax.random.normal(kx1, (2, 5, 6, 128), jnp.float32).astype(jnp.bfloat16)
    ya = adaptive_maxpool_7x7(xa)
    assert bool(jnp.allclose(ya, _adaptive_pool_ref(xa.astype(jnp.float32)),
                             rtol=1e-5, atol=1e-5)), "adaptive pool mismatch"

    # --- full forward (matches fast_rcnn_net.forward semantics) -------------
    x = jax.random.normal(k_x, (2, 3, 32, 32), jnp.float32)      # NCHW input
    region_projs = jax.random.normal(k_r, (2, 4), jnp.float32)   # unused by forward
    params = init_params(k_p)

    fwd = jax.jit(fast_rcnn_forward)
    out = jax.block_until_ready(fwd(params, x, region_projs))

    assert out.shape == (2, 512, 7, 7), out.shape
    assert out.dtype == jnp.float32
    assert bool(jnp.all(jnp.isfinite(out)))
    out_ref = _forward_ref(params, x)
    assert bool(jnp.allclose(out, out_ref, rtol=5e-2, atol=5e-2)), "forward mismatch"
    print("KERNEL_OK")
</pallas_src>

<mosaic_0001>
module attributes {stable_mosaic.version = 11 : i64} {
  func.func @_conv3x3_kernel(%arg0: i32, %arg1: i32, %arg2: memref<1x16x16x128xbf16, #tpu.memory_space<any>>, %arg3: memref<9x128x128xbf16, #tpu.memory_space<vmem>>, %arg4: memref<1x128xf32, #tpu.memory_space<vmem>>, %arg5: memref<1x4x16x128xbf16, #tpu.memory_space<vmem>>, %arg6: memref<1x6x16x128xbf16, #tpu.memory_space<vmem>>, %arg7: memref<3x!tpu.dma_semaphore, #tpu.memory_space<semaphore_mem>>) attributes {dimension_semantics = [#tpu.dimension_semantics<parallel>, #tpu.dimension_semantics<parallel>], iteration_bounds = array<i64: 1, 4>, scalar_prefetch = 0 : i64, scratch_operands = 2 : i64, tpu.core_type = #tpu.core_type<tc>, window_params = [{}, {pipeline_mode = #tpu.pipeline_mode<synchronous>, transform_indices = @transform_1, window_bounds = array<i64: 9, 128, 128>}, {pipeline_mode = #tpu.pipeline_mode<synchronous>, transform_indices = @transform_2, window_bounds = array<i64: 1, 128>}, {transform_indices = @transform_3, window_bounds = array<i64: 1, 4, 16, 128>}]} {
    %c4_i32 = arith.constant 4 : i32
    %0 = arith.muli %arg1, %c4_i32 : i32
    %c1_i32 = arith.constant 1 : i32
    %1 = arith.subi %0, %c1_i32 : i32
    %c0_i32 = arith.constant 0 : i32
    %2 = arith.maxsi %1, %c0_i32 : i32
    %c4_i32_0 = arith.constant 4 : i32
    %3 = arith.addi %0, %c4_i32_0 : i32
    %c15_i32 = arith.constant 15 : i32
    %4 = arith.minsi %3, %c15_i32 : i32
    %c0_i32_1 = arith.constant 0 : i32
    %c0_i32_2 = arith.constant 0 : i32
    %c0_i32_3 = arith.constant 0 : i32
    %5 = tpu.memref_slice %arg2[%arg0, %0, %c0_i32_2, %c0_i32_3] : memref<1x16x16x128xbf16, #tpu.memory_space<any>> -> memref<1x4x16x128xbf16, #tpu.memory_space<any>>
    %c0_i32_4 = arith.constant 0 : i32
    %c1_i32_5 = arith.constant 1 : i32
    %c0_i32_6 = arith.constant 0 : i32
    %c0_i32_7 = arith.constant 0 : i32
    %6 = tpu.memref_slice %arg6[%c0_i32_4, %c1_i32_5, %c0_i32_6, %c0_i32_7] : memref<1x6x16x128xbf16, #tpu.memory_space<vmem>> -> memref<1x4x16x128xbf16, #tpu.memory_space<vmem>>
    %7 = tpu.memref_slice %arg7[%c0_i32_1] : memref<3x!tpu.dma_semaphore, #tpu.memory_space<semaphore_mem>> -> memref<1x!tpu.dma_semaphore, #tpu.memory_space<semaphore_mem>>
    %8 = tpu.memref_squeeze %7 : memref<1x!tpu.dma_semaphore, #tpu.memory_space<semaphore_mem>> -> memref<!tpu.dma_semaphore, #tpu.memory_space<semaphore_mem>>
    tpu.enqueue_dma source(%5 : memref<1x4x16x128xbf16, #tpu.memory_space<any>>) target(%6 : memref<1x4x16x128xbf16, #tpu.memory_space<vmem>>) target_semaphore(%8 : memref<!tpu.dma_semaphore, #tpu.memory_space<semaphore_mem>>)
    %c0_i32_8 = arith.constant 0 : i32
    %9 = arith.cmpi sgt, %arg1, %c0_i32_8 : i32
    %10 = arith.extui %9 : i1 to i32
    %c1_i32_9 = arith.constant 1 : i32
    %c0_i32_10 = arith.constant 0 : i32
    %11 = arith.cmpi ne, %10, %c0_i32_10 : i32
    scf.if %11 {
      %c0_i32_77 = arith.constant 0 : i32
      %c0_i32_78 = arith.constant 0 : i32
      %107 = tpu.memref_slice %arg2[%arg0, %2, %c0_i32_77, %c0_i32_78] : memref<1x16x16x128xbf16, #tpu.memory_space<any>> -> memref<1x1x16x128xbf16, #tpu.memory_space<any>>
      %c0_i32_79 = arith.constant 0 : i32
      %c0_i32_80 = arith.constant 0 : i32
      %c0_i32_81 = arith.constant 0 : i32
      %c0_i32_82 = arith.constant 0 : i32
      %108 = tpu.memref_slice %arg6[%c0_i32_79, %c0_i32_80, %c0_i32_81, %c0_i32_82] : memref<1x6x16x128xbf16, #tpu.memory_space<vmem>> -> memref<1x1x16x128xbf16, #tpu.memory_space<vmem>>
      %109 = tpu.memref_slice %arg7[%c1_i32_9] : memref<3x!tpu.dma_semaphore, #tpu.memory_space<semaphore_mem>> -> memref<1x!tpu.dma_semaphore, #tpu.memory_space<semaphore_mem>>
      %110 = tpu.memref_squeeze %109 : memref<1x!tpu.dma_semaphore, #tpu.memory_space<semaphore_mem>> -> memref<!tpu.dma_semaphore, #tpu.memory_space<semaphore_mem>>
      tpu.enqueue_dma source(%107 : memref<1x1x16x128xbf16, #tpu.memory_space<any>>) target(%108 : memref<1x1x16x128xbf16, #tpu.memory_space<vmem>>) target_semaphore(%110 : memref<!tpu.dma_semaphore, #tpu.memory_space<semaphore_mem>>)
    } else {
    }
    %c3_i32 = arith.constant 3 : i32
    %12 = arith.cmpi slt, %arg1, %c3_i32 : i32
    %13 = arith.extui %12 : i1 to i32
    %c2_i32 = arith.constant 2 : i32
    %c0_i32_11 = arith.constant 0 : i32
    %14 = arith.cmpi ne, %13, %c0_i32_11 : i32
    scf.if %14 {
      %c0_i32_77 = arith.constant 0 : i32
      %c0_i32_78 = arith.constant 0 : i32
      %107 = tpu.memref_slice %arg2[%arg0, %4, %c0_i32_77, %c0_i32_78] : memref<1x16x16x128xbf16, #tpu.memory_space<any>> -> memref<1x1x16x128xbf16, #tpu.memory_space<any>>
      %c0_i32_79 = arith.constant 0 : i32
      %c5_i32 = arith.constant 5 : i32
      %c0_i32_80 = arith.constant 0 : i32
      %c0_i32_81 = arith.constant 0 : i32
      %108 = tpu.memref_slice %arg6[%c0_i32_79, %c5_i32, %c0_i32_80, %c0_i32_81] : memref<1x6x16x128xbf16, #tpu.memory_space<vmem>> -> memref<1x1x16x128xbf16, #tpu.memory_space<vmem>>
      %109 = tpu.memref_slice %arg7[%c2_i32] : memref<3x!tpu.dma_semaphore, #tpu.memory_space<semaphore_mem>> -> memref<1x!tpu.dma_semaphore, #tpu.memory_space<semaphore_mem>>
      %110 = tpu.memref_squeeze %109 : memref<1x!tpu.dma_semaphore, #tpu.memory_space<semaphore_mem>> -> memref<!tpu.dma_semaphore, #tpu.memory_space<semaphore_mem>>
      tpu.enqueue_dma source(%107 : memref<1x1x16x128xbf16, #tpu.memory_space<any>>) target(%108 : memref<1x1x16x128xbf16, #tpu.memory_space<vmem>>) target_semaphore(%110 : memref<!tpu.dma_semaphore, #tpu.memory_space<semaphore_mem>>)
    } else {
    }
    %cst = arith.constant 0.000000e+00 : bf16
    %15 = vector.broadcast %cst : bf16 to vector<1x16x128xbf16>
    %c0_i32_12 = arith.constant 0 : i32
    %16 = arith.cmpi eq, %arg1, %c0_i32_12 : i32
    %17 = arith.extui %16 : i1 to i32
    %c0_i32_13 = arith.constant 0 : i32
    %18 = arith.cmpi ne, %17, %c0_i32_13 : i32
    scf.if %18 {
      %c0_77 = arith.constant 0 : index
      %c0_78 = arith.constant 0 : index
      %c0_79 = arith.constant 0 : index
      %c0_80 = arith.constant 0 : index
      %107 = vector.load %arg6[%c0_77, %c0_78, %c0_79, %c0_80] : memref<1x6x16x128xbf16, #tpu.memory_space<vmem>>, vector<1x1x16x128xbf16>
      %108 = vector.shape_cast %107 : vector<1x1x16x128xbf16> to vector<1x16x128xbf16>
      %109 = vector.shape_cast %15 : vector<1x16x128xbf16> to vector<1x1x16x128xbf16>
      tpu.vector_store %arg6[%c0_77, %c0_78, %c0_79, %c0_80], %109 {strides = array<i32>} : memref<1x6x16x128xbf16, #tpu.memory_space<vmem>>, vector<1x1x16x128xbf16>,
    } else {
    }
    %c3_i32_14 = arith.constant 3 : i32
    %19 = arith.cmpi eq, %arg1, %c3_i32_14 : i32
    %20 = arith.extui %19 : i1 to i32
    %c0_i32_15 = arith.constant 0 : i32
    %21 = arith.cmpi ne, %20, %c0_i32_15 : i32
    scf.if %21 {
      %c0_77 = arith.constant 0 : index
      %c5_78 = arith.constant 5 : index
      %c0_79 = arith.constant 0 : index
      %c0_80 = arith.constant 0 : index
      %107 = vector.load %arg6[%c0_77, %c5_78, %c0_79, %c0_80] : memref<1x6x16x128xbf16, #tpu.memory_space<vmem>>, vector<1x1x16x128xbf16>
      %108 = vector.shape_cast %107 : vector<1x1x16x128xbf16> to vector<1x16x128xbf16>
      %109 = vector.shape_cast %15 : vector<1x16x128xbf16> to vector<1x1x16x128xbf16>
      tpu.vector_store %arg6[%c0_77, %c5_78, %c0_79, %c0_80], %109 {strides = array<i32>} : memref<1x6x16x128xbf16, #tpu.memory_space<vmem>>, vector<1x1x16x128xbf16>,
    } else {
    }
    %c0_i32_16 = arith.constant 0 : i32
    %c0_i32_17 = arith.constant 0 : i32
    %c0_i32_18 = arith.constant 0 : i32
    %22 = tpu.memref_slice %arg2[%arg0, %0, %c0_i32_17, %c0_i32_18] : memref<1x16x16x128xbf16, #tpu.memory_space<any>> -> memref<1x4x16x128xbf16, #tpu.memory_space<any>>
    %c0_i32_19 = arith.constant 0 : i32
    %c1_i32_20 = arith.constant 1 : i32
    %c0_i32_21 = arith.constant 0 : i32
    %c0_i32_22 = arith.constant 0 : i32
    %23 = tpu.memref_slice %arg6[%c0_i32_19, %c1_i32_20, %c0_i32_21, %c0_i32_22] : memref<1x6x16x128xbf16, #tpu.memory_space<vmem>> -> memref<1x4x16x128xbf16, #tpu.memory_space<vmem>>
    %24 = tpu.memref_slice %arg7[%c0_i32_16] : memref<3x!tpu.dma_semaphore, #tpu.memory_space<semaphore_mem>> -> memref<1x!tpu.dma_semaphore, #tpu.memory_space<semaphore_mem>>
    %25 = tpu.memref_squeeze %24 : memref<1x!tpu.dma_semaphore, #tpu.memory_space<semaphore_mem>> -> memref<!tpu.dma_semaphore, #tpu.memory_space<semaphore_mem>>
    tpu.wait_dma2 semaphore(%25 : memref<!tpu.dma_semaphore, #tpu.memory_space<semaphore_mem>>) src(%22 : memref<1x4x16x128xbf16, #tpu.memory_space<any>>) dst(%23 : memref<1x4x16x128xbf16, #tpu.memory_space<vmem>>)
    %c0_i32_23 = arith.constant 0 : i32
    %26 = arith.cmpi sgt, %arg1, %c0_i32_23 : i32
    %27 = arith.extui %26 : i1 to i32
    %c1_i32_24 = arith.constant 1 : i32
    %c0_i32_25 = arith.constant 0 : i32
    %28 = arith.cmpi ne, %27, %c0_i32_25 : i32
    scf.if %28 {
      %c0_i32_77 = arith.constant 0 : i32
      %c0_i32_78 = arith.constant 0 : i32
      %107 = tpu.memref_slice %arg2[%arg0, %2, %c0_i32_77, %c0_i32_78] : memref<1x16x16x128xbf16, #tpu.memory_space<any>> -> memref<1x1x16x128xbf16, #tpu.memory_space<any>>
      %c0_i32_79 = arith.constant 0 : i32
      %c0_i32_80 = arith.constant 0 : i32
      %c0_i32_81 = arith.constant 0 : i32
      %c0_i32_82 = arith.constant 0 : i32
      %108 = tpu.memref_slice %arg6[%c0_i32_79, %c0_i32_80, %c0_i32_81, %c0_i32_82] : memref<1x6x16x128xbf16, #tpu.memory_space<vmem>> -> memref<1x1x16x128xbf16, #tpu.memory_space<vmem>>
      %109 = tpu.memref_slice %arg7[%c1_i32_24] : memref<3x!tpu.dma_semaphore, #tpu.memory_space<semaphore_mem>> -> memref<1x!tpu.dma_semaphore, #tpu.memory_space<semaphore_mem>>
      %110 = tpu.memref_squeeze %109 : memref<1x!tpu.dma_semaphore, #tpu.memory_space<semaphore_mem>> -> memref<!tpu.dma_semaphore, #tpu.memory_space<semaphore_mem>>
      tpu.wait_dma2 semaphore(%110 : memref<!tpu.dma_semaphore, #tpu.memory_space<semaphore_mem>>) src(%107 : memref<1x1x16x128xbf16, #tpu.memory_space<any>>) dst(%108 : memref<1x1x16x128xbf16, #tpu.memory_space<vmem>>)
    } else {
    }
    %c3_i32_26 = arith.constant 3 : i32
    %29 = arith.cmpi slt, %arg1, %c3_i32_26 : i32
    %30 = arith.extui %29 : i1 to i32
    %c2_i32_27 = arith.constant 2 : i32
    %c0_i32_28 = arith.constant 0 : i32
    %31 = arith.cmpi ne, %30, %c0_i32_28 : i32
    scf.if %31 {
      %c0_i32_77 = arith.constant 0 : i32
      %c0_i32_78 = arith.constant 0 : i32
      %107 = tpu.memref_slice %arg2[%arg0, %4, %c0_i32_77, %c0_i32_78] : memref<1x16x16x128xbf16, #tpu.memory_space<any>> -> memref<1x1x16x128xbf16, #tpu.memory_space<any>>
      %c0_i32_79 = arith.constant 0 : i32
      %c5_i32 = arith.constant 5 : i32
      %c0_i32_80 = arith.constant 0 : i32
      %c0_i32_81 = arith.constant 0 : i32
      %108 = tpu.memref_slice %arg6[%c0_i32_79, %c5_i32, %c0_i32_80, %c0_i32_81] : memref<1x6x16x128xbf16, #tpu.memory_space<vmem>> -> memref<1x1x16x128xbf16, #tpu.memory_space<vmem>>
      %109 = tpu.memref_slice %arg7[%c2_i32_27] : memref<3x!tpu.dma_semaphore, #tpu.memory_space<semaphore_mem>> -> memref<1x!tpu.dma_semaphore, #tpu.memory_space<semaphore_mem>>
      %110 = tpu.memref_squeeze %109 : memref<1x!tpu.dma_semaphore, #tpu.memory_space<semaphore_mem>> -> memref<!tpu.dma_semaphore, #tpu.memory_space<semaphore_mem>>
      tpu.wait_dma2 semaphore(%110 : memref<!tpu.dma_semaphore, #tpu.memory_space<semaphore_mem>>) src(%107 : memref<1x1x16x128xbf16, #tpu.memory_space<any>>) dst(%108 : memref<1x1x16x128xbf16, #tpu.memory_space<vmem>>)
    } else {
    }
    %cst_29 = arith.constant 0.000000e+00 : f32
    %32 = vector.broadcast %cst_29 : f32 to vector<64x128xf32>
    %cst_30 = arith.constant 0.000000e+00 : bf16
    %33 = vector.broadcast %cst_30 : bf16 to vector<4x1x128xbf16>
    %c0 = arith.constant 0 : index
    %c0_31 = arith.constant 0 : index
    %c0_32 = arith.constant 0 : index
    %c0_33 = arith.constant 0 : index
    %34 = vector.load %arg6[%c0, %c0_31, %c0_32, %c0_33] : memref<1x6x16x128xbf16, #tpu.memory_space<vmem>>, vector<1x4x16x128xbf16>
    %35 = vector.shape_cast %34 : vector<1x4x16x128xbf16> to vector<4x16x128xbf16>
    %36 = vector.extract_strided_slice %35 {offsets = [0, 0, 0], sizes = [4, 15, 128], strides = [1, 1, 1]} : vector<4x16x128xbf16> to vector<4x15x128xbf16>
    %37 = tpu.concatenate %33, %36 in 1 : vector<4x1x128xbf16>, vector<4x15x128xbf16> -> vector<4x16x128xbf16>
    %38 = vector.extract_strided_slice %35 {offsets = [0, 1, 0], sizes = [4, 15, 128], strides = [1, 1, 1]} : vector<4x16x128xbf16> to vector<4x15x128xbf16>
    %39 = tpu.concatenate %38, %33 in 1 : vector<4x15x128xbf16>, vector<4x1x128xbf16> -> vector<4x16x128xbf16>
    %40 = vector.shape_cast %37 : vector<4x16x128xbf16> to vector<64x128xbf16>
    %c0_34 = arith.constant 0 : index
    %c0_35 = arith.constant 0 : index
    %c0_36 = arith.constant 0 : index
    %41 = vector.load %arg3[%c0_34, %c0_35, %c0_36] : memref<9x128x128xbf16, #tpu.memory_space<vmem>>, vector<1x128x128xbf16>
    %42 = vector.shape_cast %41 : vector<1x128x128xbf16> to vector<128x128xbf16>
    %cst_37 = arith.constant dense<0.000000e+00> : vector<64x128xf32>
    %43 = tpu.matmul %40, %42, %cst_37 {dimension_numbers = #tpu.dot_dimension_numbers<[1], [0], [0], [1], [0, 0, 1, 1], [], []>} : vector<64x128xbf16>, vector<128x128xbf16>, vector<64x128xf32> -> vector<64x128xf32>
    %44 = arith.addf %32, %43 : vector<64x128xf32>
    %45 = vector.shape_cast %35 : vector<4x16x128xbf16> to vector<64x128xbf16>
    %c1 = arith.constant 1 : index
    %c0_38 = arith.constant 0 : index
    %c0_39 = arith.constant 0 : index
    %46 = vector.load %arg3[%c1, %c0_38, %c0_39] : memref<9x128x128xbf16, #tpu.memory_space<vmem>>, vector<1x128x128xbf16>
    %47 = vector.shape_cast %46 : vector<1x128x128xbf16> to vector<128x128xbf16>
    %cst_40 = arith.constant dense<0.000000e+00> : vector<64x128xf32>
    %48 = tpu.matmul %45, %47, %cst_40 {dimension_numbers = #tpu.dot_dimension_numbers<[1], [0], [0], [1], [0, 0, 1, 1], [], []>} : vector<64x128xbf16>, vector<128x128xbf16>, vector<64x128xf32> -> vector<64x128xf32>
    %49 = arith.addf %44, %48 : vector<64x128xf32>
    %50 = vector.shape_cast %39 : vector<4x16x128xbf16> to vector<64x128xbf16>
    %c2 = arith.constant 2 : index
    %c0_41 = arith.constant 0 : index
    %c0_42 = arith.constant 0 : index
    %51 = vector.load %arg3[%c2, %c0_41, %c0_42] : memref<9x128x128xbf16, #tpu.memory_space<vmem>>, vector<1x128x128xbf16>
    %52 = vector.shape_cast %51 : vector<1x128x128xbf16> to vector<128x128xbf16>
    %cst_43 = arith.constant dense<0.000000e+00> : vector<64x128xf32>
    %53 = tpu.matmul %50, %52, %cst_43 {dimension_numbers = #tpu.dot_dimension_numbers<[1], [0], [0], [1], [0, 0, 1, 1], [], []>} : vector<64x128xbf16>, vector<128x128xbf16>, vector<64x128xf32> -> vector<64x128xf32>
    %54 = arith.addf %49, %53 : vector<64x128xf32>
    %c0_44 = arith.constant 0 : index
    %c1_45 = arith.constant 1 : index
    %c0_46 = arith.constant 0 : index
    %c0_47 = arith.constant 0 : index
    %55 = vector.load %arg6[%c0_44, %c1_45, %c0_46, %c0_47] : memref<1x6x16x128xbf16, #tpu.memory_space<vmem>>, vector<1x4x16x128xbf16>
    %56 = vector.shape_cast %55 : vector<1x4x16x128xbf16> to vector<4x16x128xbf16>
    %57 = vector.extract_strided_slice %56 {offsets = [0, 0, 0], sizes = [4, 15, 128], strides = [1, 1, 1]} : vector<4x16x128xbf16> to vector<4x15x128xbf16>
    %58 = tpu.concatenate %33, %57 in 1 : vector<4x1x128xbf16>, vector<4x15x128xbf16> -> vector<4x16x128xbf16>
    %59 = vector.extract_strided_slice %56 {offsets = [0, 1, 0], sizes = [4, 15, 128], strides = [1, 1, 1]} : vector<4x16x128xbf16> to vector<4x15x128xbf16>
    %60 = tpu.concatenate %59, %33 in 1 : vector<4x15x128xbf16>, vector<4x1x128xbf16> -> vector<4x16x128xbf16>
    %61 = vector.shape_cast %58 : vector<4x16x128xbf16> to vector<64x128xbf16>
    %c3 = arith.constant 3 : index
    %c0_48 = arith.constant 0 : index
    %c0_49 = arith.constant 0 : index
    %62 = vector.load %arg3[%c3, %c0_48, %c0_49] : memref<9x128x128xbf16, #tpu.memory_space<vmem>>, vector<1x128x128xbf16>
    %63 = vector.shape_cast %62 : vector<1x128x128xbf16> to vector<128x128xbf16>
    %cst_50 = arith.constant dense<0.000000e+00> : vector<64x128xf32>
    %64 = tpu.matmul %61, %63, %cst_50 {dimension_numbers = #tpu.dot_dimension_numbers<[1], [0], [0], [1], [0, 0, 1, 1], [], []>} : vector<64x128xbf16>, vector<128x128xbf16>, vector<64x128xf32> -> vector<64x128xf32>
    %65 = arith.addf %54, %64 : vector<64x128xf32>
    %66 = vector.shape_cast %56 : vector<4x16x128xbf16> to vector<64x128xbf16>
    %c4 = arith.constant 4 : index
    %c0_51 = arith.constant 0 : index
    %c0_52 = arith.constant 0 : index
    %67 = vector.load %arg3[%c4, %c0_51, %c0_52] : memref<9x128x128xbf16, #tpu.memory_space<vmem>>, vector<1x128x128xbf16>
    %68 = vector.shape_cast %67 : vector<1x128x128xbf16> to vector<128x128xbf16>
    %cst_53 = arith.constant dense<0.000000e+00> : vector<64x128xf32>
    %69 = tpu.matmul %66, %68, %cst_53 {dimension_numbers = #tpu.dot_dimension_numbers<[1], [0], [0], [1], [0, 0, 1, 1], [], []>} : vector<64x128xbf16>, vector<128x128xbf16>, vector<64x128xf32> -> vector<64x128xf32>
    %70 = arith.addf %65, %69 : vector<64x128xf32>
    %71 = vector.shape_cast %60 : vector<4x16x128xbf16> to vector<64x128xbf16>
    %c5 = arith.constant 5 : index
    %c0_54 = arith.constant 0 : index
    %c0_55 = arith.constant 0 : index
    %72 = vector.load %arg3[%c5, %c0_54, %c0_55] : memref<9x128x128xbf16, #tpu.memory_space<vmem>>, vector<1x128x128xbf16>
    %73 = vector.shape_cast %72 : vector<1x128x128xbf16> to vector<128x128xbf16>
    %cst_56 = arith.constant dense<0.000000e+00> : vector<64x128xf32>
    %74 = tpu.matmul %71, %73, %cst_56 {dimension_numbers = #tpu.dot_dimension_numbers<[1], [0], [0], [1], [0, 0, 1, 1], [], []>} : vector<64x128xbf16>, vector<128x128xbf16>, vector<64x128xf32> -> vector<64x128xf32>
    %75 = arith.addf %70, %74 : vector<64x128xf32>
    %c0_57 = arith.constant 0 : index
    %c2_58 = arith.constant 2 : index
    %c0_59 = arith.constant 0 : index
    %c0_60 = arith.constant 0 : index
    %76 = vector.load %arg6[%c0_57, %c2_58, %c0_59, %c0_60] : memref<1x6x16x128xbf16, #tpu.memory_space<vmem>>, vector<1x4x16x128xbf16>
    %77 = vector.shape_cast %76 : vector<1x4x16x128xbf16> to vector<4x16x128xbf16>
    %78 = vector.extract_strided_slice %77 {offsets = [0, 0, 0], sizes = [4, 15, 128], strides = [1, 1, 1]} : vector<4x16x128xbf16> to vector<4x15x128xbf16>
    %79 = tpu.concatenate %33, %78 in 1 : vector<4x1x128xbf16>, vector<4x15x128xbf16> -> vector<4x16x128xbf16>
    %80 = vector.extract_strided_slice %77 {offsets = [0, 1, 0], sizes = [4, 15, 128], strides = [1, 1, 1]} : vector<4x16x128xbf16> to vector<4x15x128xbf16>
    %81 = tpu.concatenate %80, %33 in 1 : vector<4x15x128xbf16>, vector<4x1x128xbf16> -> vector<4x16x128xbf16>
    %82 = vector.shape_cast %79 : vector<4x16x128xbf16> to vector<64x128xbf16>
    %c6 = arith.constant 6 : index
    %c0_61 = arith.constant 0 : index
    %c0_62 = arith.constant 0 : index
    %83 = vector.load %arg3[%c6, %c0_61, %c0_62] : memref<9x128x128xbf16, #tpu.memory_space<vmem>>, vector<1x128x128xbf16>
    %84 = vector.shape_cast %83 : vector<1x128x128xbf16> to vector<128x128xbf16>
    %cst_63 = arith.constant dense<0.000000e+00> : vector<64x128xf32>
    %85 = tpu.matmul %82, %84, %cst_63 {dimension_numbers = #tpu.dot_dimension_numbers<[1], [0], [0], [1], [0, 0, 1, 1], [], []>} : vector<64x128xbf16>, vector<128x128xbf16>, vector<64x128xf32> -> vector<64x128xf32>
    %86 = arith.addf %75, %85 : vector<64x128xf32>
    %87 = vector.shape_cast %77 : vector<4x16x128xbf16> to vector<64x128xbf16>
    %c7 = arith.constant 7 : index
    %c0_64 = arith.constant 0 : index
    %c0_65 = arith.constant 0 : index
    %88 = vector.load %arg3[%c7, %c0_64, %c0_65] : memref<9x128x128xbf16, #tpu.memory_space<vmem>>, vector<1x128x128xbf16>
    %89 = vector.shape_cast %88 : vector<1x128x128xbf16> to vector<128x128xbf16>
    %cst_66 = arith.constant dense<0.000000e+00> : vector<64x128xf32>
    %90 = tpu.matmul %87, %89, %cst_66 {dimension_numbers = #tpu.dot_dimension_numbers<[1], [0], [0], [1], [0, 0, 1, 1], [], []>} : vector<64x128xbf16>, vector<128x128xbf16>, vector<64x128xf32> -> vector<64x128xf32>
    %91 = arith.addf %86, %90 : vector<64x128xf32>
    %92 = vector.shape_cast %81 : vector<4x16x128xbf16> to vector<64x128xbf16>
    %c8 = arith.constant 8 : index
    %c0_67 = arith.constant 0 : index
    %c0_68 = arith.constant 0 : index
    %93 = vector.load %arg3[%c8, %c0_67, %c0_68] : memref<9x128x128xbf16, #tpu.memory_space<vmem>>, vector<1x128x128xbf16>
    %94 = vector.shape_cast %93 : vector<1x128x128xbf16> to vector<128x128xbf16>
    %cst_69 = arith.constant dense<0.000000e+00> : vector<64x128xf32>
    %95 = tpu.matmul %92, %94, %cst_69 {dimension_numbers = #tpu.dot_dimension_numbers<[1], [0], [0], [1], [0, 0, 1, 1], [], []>} : vector<64x128xbf16>, vector<128x128xbf16>, vector<64x128xf32> -> vector<64x128xf32>
    %96 = arith.addf %91, %95 : vector<64x128xf32>
    %c0_70 = arith.constant 0 : index
    %c0_71 = arith.constant 0 : index
    %97 = vector.load %arg4[%c0_70, %c0_71] : memref<1x128xf32, #tpu.memory_space<vmem>>, vector<1x128xf32>
    %98 = vector.broadcast %97 : vector<1x128xf32> to vector<64x128xf32>
    %99 = arith.addf %96, %98 : vector<64x128xf32>
    %cst_72 = arith.constant 0.000000e+00 : f32
    %100 = vector.broadcast %cst_72 : f32 to vector<64x128xf32>
    %101 = arith.maximumf %99, %100 : vector<64x128xf32>
    %102 = vector.shape_cast %101 : vector<64x128xf32> to vector<4x16x128xf32>
    %103 = arith.truncf %102 : vector<4x16x128xf32> to vector<4x16x128xbf16>
    %c0_73 = arith.constant 0 : index
    %c0_74 = arith.constant 0 : index
    %c0_75 = arith.constant 0 : index
    %c0_76 = arith.constant 0 : index
    %104 = vector.load %arg5[%c0_73, %c0_74, %c0_75, %c0_76] : memref<1x4x16x128xbf16, #tpu.memory_space<vmem>>, vector<1x4x16x128xbf16>
    %105 = vector.shape_cast %104 : vector<1x4x16x128xbf16> to vector<4x16x128xbf16>
    %106 = vector.shape_cast %103 : vector<4x16x128xbf16> to vector<1x4x16x128xbf16>
    tpu.vector_store %arg5[%c0_73, %c0_74, %c0_75, %c0_76], %106 {strides = array<i32>} : memref<1x4x16x128xbf16, #tpu.memory_space<vmem>>, vector<1x4x16x128xbf16>,
    return
  }
  func.func @transform_1(%arg0: i32, %arg1: i32) -> (i32, i32, i32) {
    %c0_i32 = arith.constant 0 : i32
    %c0_i32_0 = arith.constant 0 : i32
    %c0_i32_1 = arith.constant 0 : i32
    %c0_i32_2 = arith.constant 0 : i32
    return %c0_i32, %c0_i32_0, %c0_i32_1 : i32, i32, i32
  }
  func.func @transform_2(%arg0: i32, %arg1: i32) -> (i32, i32) {
    %c0_i32 = arith.constant 0 : i32
    %c0_i32_0 = arith.constant 0 : i32
    %c0_i32_1 = arith.constant 0 : i32
    return %c0_i32, %c0_i32_0 : i32, i32
  }
  func.func @transform_3(%arg0: i32, %arg1: i32) -> (i32, i32, i32, i32) {
    %c0_i32 = arith.constant 0 : i32
    %c0_i32_0 = arith.constant 0 : i32
    %c0_i32_1 = arith.constant 0 : i32
    return %arg0, %arg1, %c0_i32, %c0_i32_0 : i32, i32, i32, i32
  }
}

</mosaic_0001>

<bundles_post_ra>
// kernel: tpu_custom_call.1
= control target key start
LH: loop header
LB: loop body
LE: loop exit
PB: predicated region body
PF: predicated region fallthrough
CT: control target
= control target key end

     0   :  { %8 = vsyncpa [#allocation5], 0  ;;  %s2764_s0 = inlined_call_operand.hbm [shape: bf16[1,16,16,128], index: 0, kind: input, shape index: {}]   ;;  %s2765_s1 = inlined_call_operand.hbm [shape: bf16[9,128,128], index: 1, kind: input, shape index: {}]   ;;  %s2766_s2 = inlined_call_operand.vmem [shape: f32[1,128], index: 2, kind: input, shape index: {}]   ;;  %s2767_s3 = inlined_call_operand.hbm [shape: bf16[1,16,16,128], index: 3, kind: output, shape index: {}]  }
   0x1   :  { %9 = vsyncpa [#allocation6], 0 }
   0x2   :  { %11 = vsyncpa [#allocation6 + $0x1], 0  ;;  %s2404_s12 = smov 0   ;;  %s2406_s13 = smov 0  }
   0x3   :  { %s2408_s14 = smov 0   ;;  %s2410_s15 = smov 0  }
   0x4   :  { %s2412_s16 = smov 0   ;;  %s2414_s17 = smov 0  }
   0x5 LB: > { %s1587_s18 = sadd.s32 4294967295, %s2372_s17   ;;  %s1588_s19 = sadd.s32 4294967294, %s2372_s17   ;;  %s2372_s17 = sphi %s2414_s17, %s17_s17   ;;  %s2368_s16 = sphi %s2412_s16, %s2780_s16   ;;  %s2364_s15 = sphi %s2410_s15, %s2779_s15   ;;  %s2360_s14 = sphi %s2408_s14, %s2778_s14   ;;  %s2356_s13 = sphi %s2406_s13, %s2777_s13   ;;  %s2352_s12 = sphi %s2404_s12, %s2776_s12  }
   0x6   : > { %s26_s20 = sadd.s32 1, %s2368_s16  ;;  %s80_s21 = sadd.s32 1, %s2360_s14 }
   0x7   : > { %p27_p0 = scmp.ge.s32.totalorder %s26_s20, 4  ;;  %p90_p1 = scmp.ne.s32.totalorder %s2360_s14, %s2356_s13 }
   0x8   : > { %p91_p2 = scmp.eq.s32.totalorder %s1587_s18, 3  ;;  %p96_p3 = scmp.ne.s32.totalorder %s2356_s13, %s2352_s12 }
   0x9   : > { %s2782_s20 = smov (%p27_p0, %s26_s20), 0  ;;  %p97_p5 = scmp.eq.s32.totalorder %s1588_s19, 3 }
   0xa   : > { %p2444_p4 = por %p91_p2, %p90_p1  ;;  %s76_s23 = ssub.s32 %s2368_s16, %s2782_s20 }
   0xb   : > { %p1589_p6 = scmp.ge.s32.totalorder %s2372_s17, 1  ;;  %p78_p7 = scmp.eq.s32.totalorder %s76_s23, 0 }
   0xc   : > { %p2451_p8 = por %p97_p5, %p96_p3  ;;  %p104_p9 = scmp.lt.s32.totalorder %s2372_s17, 5 }
   0xd   : > { %s2457_s25 = scalar_select %p78_p7, %s2360_s14, %s80_s21  }
   0xe   : > { %p105_p10 = pnand %p1589_p6, %p104_p9  ;;  %p2104_p11 = scmp.eq.s32.totalorder %s1587_s18, 0 }
   0xf   : > { %s115_s28 = sshll.u32 %s2765_s1, 4  ;;  %s2374_s29 = smov [#allocation4]   ;;  %s116_s28 = int_to_ptr.hbm [resolvable:$true] %s115_s28 }
  0x10   : > { %p2096_p12 = pneg %p105_p10  ;;  %s117_s30 = sshll.u32 %s2374_s29, 4  ;;  %s118_s30 = int_to_ptr.vmem [resolvable:$true] %s117_s30 }
  0x11   : > { %s2375_s4 = smov 64   ;;  %s2376_s5 = smov 4  }
  0x12   : > { %p2097_p13 = pnand %p2104_p11, %p2096_p12  ;;  %136 = sbr.rel (%p105_p10) target bundleno = 426 (0x1aa), region = 28 }
  0x14   : > { %2099 = dma.hbm_to_vmem [thread:$0]  (!%p2097_p13), %s116_s28, 9216, %s118_s30, [#allocation5], %s2375_s4, %s2375_s4, %s2376_s5  }
  0x17   : > { %2333 = dma.done.wait (%p2104_p11), [#allocation5], 9216  }
  0x18   : > { %2335 = vsyncadd (%p2104_p11), [#allocation5], 4294958080  ;;  %s2768_s6 = sand.u32 1, %s2356_s13   ;;  %s1954_s7 = sshll.u32 %s2364_s15, 5 }
  0x19   : > { %s2466_s8 = sshll.u32 %s2768_s6, 5  ;;  %s167_s11 = scalar_lea.hbm %s2764_s0, %s1954_s7 }
  0x1a   : > { %s176_s18 = sshll.u32 %s167_s11, 4  ;;  %s2377_s19 = smov [#allocation2 + $0x8]   ;;  %s177_s18 = int_to_ptr.hbm [resolvable:$true] %s176_s18 }
  0x1b   : > { %s178_s21 = sshll.u32 %s2377_s19, 4  ;;  %s1594_s23 = sshll.u32 %s2364_s15, 2  ;;  %s179_s21 = int_to_ptr.vmem [resolvable:$true] %s178_s21 }
  0x1c   : > { %s1595_s26 = sadd.s32 4294967295, %s1594_s23  ;;  %s2200_s27 = sshra.s32 %s177_s18, 4  ;;  %s2201_s27 = int_to_ptr.hbm [resolvable:$true] %s2200_s27 }
  0x1d   : > { %s2202_s28 = scalar_lea.hbm %s2201_s27, 32  ;;  %s2477_s4 = scalar_lea.hbm %s2764_s0, 128 }
  0x1e   : > { %p2203_p0 = scmp.ne.s32.totalorder %s2201_s27, %s2202_s28  ;;  %p2205_p1 = scmp.lt.s32.totalorder %s2201_s27, %s2764_s0 }
  0x1f   : > { %p2206_p2 = scmp.lt.s32.totalorder %s2477_s4, %s2202_s28 }
  0x21   : > { %p2207_p3 = por %p2206_p2, %p2205_p1 }
  0x23   : > { %p2208_p5 = pnand %p2207_p3, %p2203_p0 }
  0x25   : > { %2211 = shalt.err (!%p2208_p5)  }
  0x26   : > { %181 = dma.hbm_to_vmem [thread:$0]  %s177_s18, 512, %s179_s21, [#allocation3] }
  0x27   : > { %p158_p6 = scmp.gt.s32.totalorder %s1595_s26, 0  ;;  %p2106_p7 = scmp.gt.s32.totalorder %s2364_s15, 0 }
  0x28   : > { %s2378_s9 = smov [#allocation2]   ;;  %s160_s11 = sadd.s32 4, %s1594_s23 }
  0x29   : > { %s2784_s26 = smov (!%p158_p6, %s1595_s26), 0  ;;  %s200_s10 = sshll.u32 %s2378_s9, 4  ;;  %s201_s10 = int_to_ptr.vmem [resolvable:$true] %s200_s10 }
  0x2a   : > { %s1955_s19 = sshll.u32 %s2784_s26, 3  ;;  %p161_p9 = scmp.lt.s32.totalorder %s160_s11, 15 }
  0x2b   : > { %s189_s27 = scalar_lea.hbm %s2764_s0, %s1955_s19 }
  0x2c   : > { %s198_s28 = sshll.u32 %s189_s27, 4  ;;  %s199_s28 = int_to_ptr.hbm [resolvable:$true] %s198_s28 }
  0x2d   : > { %s2224_s30 = sshra.s32 %s199_s28, 4  ;;  %s2225_s30 = int_to_ptr.hbm [resolvable:$true] %s2224_s30 }
  0x2e   : > { %s2226_s18 = scalar_lea.hbm %s2225_s30, 8  ;;  %p2231_p13 = scmp.lt.s32.totalorder %s2225_s30, %s2764_s0 }
  0x2f   : > { %p2227_p10 = scmp.ne.s32.totalorder %s2225_s30, %s2226_s18  ;;  %p2232_p0 = scmp.lt.s32.totalorder %s2477_s4, %s2226_s18 }
  0x31   : > { %p2228_p11 = pnand %p2227_p10, %p2106_p7  ;;  %p2233_p1 = por %p2232_p0, %p2231_p13 }
  0x33   : > { %p2229_p12 = pneg %p2228_p11 }
  0x35   : > { %p2234_p2 = pnand %p2233_p1, %p2229_p12 }
  0x37   : > { %2237 = shalt.err (!%p2234_p2)  }
  0x38   : > { %2087 = dma.hbm_to_vmem [thread:$0]  (%p2106_p7), %s199_s28, 128, %s201_s10, [#allocation3 + $0x1] }
  0x39   : > { %s2786_s11 = smov (!%p161_p9, %s160_s11), 15  ;;  %p2107_p3 = scmp.lt.s32.totalorder %s2364_s15, 3 }
  0x3a   : > { %s1956_s23 = sshll.u32 %s2786_s11, 3  ;;  %s2379_s26 = smov [#allocation2 + $0x28]  }
  0x3b   : > { %s223_s9 = sshll.u32 %s2379_s26, 4  ;;  %s211_s6 = scalar_lea.hbm %s2764_s0, %s1956_s23  ;;  %s224_s9 = int_to_ptr.vmem [resolvable:$true] %s223_s9 }
  0x3c   : > { %s221_s27 = sshll.u32 %s211_s6, 4  ;;  %s222_s27 = int_to_ptr.hbm [resolvable:$true] %s221_s27 }
  0x3d   : > { %s2252_s30 = sshra.s32 %s222_s27, 4  ;;  %s2253_s30 = int_to_ptr.hbm [resolvable:$true] %s2252_s30 }
  0x3e   : > { %s2254_s18 = scalar_lea.hbm %s2253_s30, 8  ;;  %p2259_p9 = scmp.lt.s32.totalorder %s2253_s30, %s2764_s0 }
  0x3f   : > { %p2255_p5 = scmp.ne.s32.totalorder %s2253_s30, %s2254_s18  ;;  %p2260_p11 = scmp.lt.s32.totalorder %s2477_s4, %s2254_s18 }
  0x41   : > { %p2256_p6 = pnand %p2255_p5, %p2107_p3  ;;  %p2261_p12 = por %p2260_p11, %p2259_p9 }
  0x43   : > { %p2257_p10 = pneg %p2256_p6 }
  0x45   : > { %p2262_p13 = pnand %p2261_p12, %p2257_p10 }
  0x47   : > { %2265 = shalt.err (!%p2262_p13)  }
  0x48   : > { %2089 = dma.hbm_to_vmem [thread:$0]  (%p2107_p3), %s222_s27, 128, %s224_s9, [#allocation3 + $0x2] }
  0x49   : > { %s2509_s11 = scalar_lea.vmem [#allocation7], %s2466_s8  ;;  %p1604_p0 = scmp.ne.s32.totalorder %s2364_s15, 0 }
  0x4b   : > { %230 = sbr.rel (%p1604_p0) target bundleno = 83 (0x53), region = 56 }
  0x50   : > { %v2380_v0 = vmov 0  }
  0x51   : > { %231 = vst [vmem:[#allocation2] sm:$0xf] %v2380_v0 }
  0x52   : > { %232 = vst [vmem:[#allocation2 + $0x4] sm:$0xf] %v2380_v0 }
  0x53 PF: > { %p1605_p1 = scmp.ne.s32.totalorder %s2364_s15, 3 }
  0x55   : > { %236 = sbr.rel (%p1605_p1) target bundleno = 93 (0x5d), region = 60 }
  0x5a   : > { %v2381_v1 = vmov 0  }
  0x5b   : > { %238 = vst [vmem:[#allocation2 + $0x28] sm:$0xf] %v2381_v1 }
  0x5c   : > { %239 = vst [vmem:[#allocation2 + $0x2c] sm:$0xf] %v2381_v1 }
  0x5d PF: > { %2336 = dma.done.wait [#allocation3], 512 }
  0x5e   : > { %2337 = vsyncadd [#allocation3], 4294966784 }
  0x5f   : > { %2339 = dma.done.wait (%p2106_p7), [#allocation3 + $0x1], 128 }
  0x60   : > { %2341 = vsyncadd (%p2106_p7), [#allocation3 + $0x1], 4294967168 }
  0x61   : > { %2343 = dma.done.wait (%p2107_p3), [#allocation3 + $0x2], 128 }
  0x62   : > { %2345 = vsyncadd (%p2107_p3), [#allocation3 + $0x2], 4294967168  ;;  %v1976_v2 = vld [vmem:[#allocation4 + $0x78] sm:$0xff]  ;;  %v1975_v4 = vld [vmem:[#allocation4 + $0x70] sm:$0xff]  ;;  %vm343_vm0 = vcmask 1047552   ;;  %vm324_vm3 = vcmask 1040384   ;;  %s1475_s23 = scalar_lea.hbm %s2767_s3, %s1954_s7 }
  0x63   : > { %v1984_v3 = vld [vmem:[#allocation4 + $0xb8] sm:$0xff]  ;;  %2066 = vmatpush.bf16.msra.mxu1 %v1976_v2  ;;  %435 = vmatpush.bf16.msra.mxu0 %v1976_v2  ;;  %v1983_v5 = vld [vmem:[#allocation4 + $0xb0] sm:$0xff]  ;;  %v1974_v8 = vld [vmem:[#allocation4 + $0x68] sm:$0xff]  ;;  %vm344_vm1 = vsmask.f32 7424  ;;  %s1476_s26 = sshll.u32 %s2509_s11, 4  ;;  %s1477_s26 = int_to_ptr.vmem [resolvable:$true] %s1476_s26 }
  0x64   : > { %606 = vmatpush.bf16.msra.mxu2 %v1984_v3  ;;  %v1996_v6 = vld [vmem:[#allocation4 + $0xf8] sm:$0xff]  ;;  %v1995_v7 = vld [vmem:[#allocation4 + $0xf0] sm:$0xff]  ;;  %v1982_v9 = vld [vmem:[#allocation4 + $0xa8] sm:$0xff]  ;;  %vm325_vm4 = vsmask.f32 256  ;;  %s1478_s9 = sshll.u32 %s1475_s23, 4  ;;  %s1479_s9 = int_to_ptr.hbm [resolvable:$true] %s1478_s9 }
  0x65   : > { %788 = vmatpush.bf16.msra.mxu3 %v1996_v6  ;;  %v1994_v10 = vld [vmem:[#allocation4 + $0xe8] sm:$0xff]  ;;  %v1973_v11 = vld [vmem:[#allocation4 + $0x60] sm:$0xff]  ;;  %v1972_v14 = vld [vmem:[#allocation4 + $0x58] sm:$0xff]  ;;  %s2775_s19 = sand.u32 1, %s2356_s13   ;;  %s2294_s29 = sshra.s32 %s1479_s9, 4  ;;  %s2295_s29 = int_to_ptr.hbm [resolvable:$true] %s2294_s29 }
  0x66   : > { %v1981_v12 = vld [vmem:[#allocation4 + $0xa0] sm:$0xff]  ;;  %v1980_v15 = vld [vmem:[#allocation4 + $0x98] sm:$0xff]  ;;  %v2521_v16 = vld [vmem:[#allocation2] sm:$0xff]  ;;  %s1461_s15 = scalar_lea.sflag [#allocation6], %s2775_s19  ;;  %s2296_s6 = scalar_lea.hbm %s2295_s29, 32 }
  0x67   : > { %2067 = vmatpush.bf16.msra.mxu1 %v1975_v4  ;;  %436 = vmatpush.bf16.msra.mxu0 %v1975_v4  ;;  %v1993_v13 = vld [vmem:[#allocation4 + $0xe0] sm:$0xff]  ;;  %v1992_v17 = vld [vmem:[#allocation4 + $0xd8] sm:$0xff]  ;;  %v1971_v18 = vld [vmem:[#allocation4 + $0x50] sm:$0xff]  ;;  %v296_v21 = vshll.u32 %v2521_v16, 16  ;;  %v293_v26 = vshrl.u32 %v2521_v16, 16  ;;  %p2297_p7 = scmp.ne.s32.totalorder %s2295_s29, %s2296_s6  ;;  %s2300_s30 = scalar_lea.hbm %s2767_s3, 128 }
  0x68   : > { %607 = vmatpush.bf16.msra.mxu2 %v1983_v5  ;;  %v2523_v19 = vld [vmem:[#allocation2 + $0x8] sm:$0xff]  ;;  %v1979_v20 = vld [vmem:[#allocation4 + $0x90] sm:$0xff]  ;;  %v1970_v23 = vld [vmem:[#allocation4 + $0x48] sm:$0xff]  ;;  %p2301_p5 = scmp.lt.s32.totalorder %s2295_s29, %s2767_s3  ;;  %p2302_p6 = scmp.lt.s32.totalorder %s2300_s30, %s2296_s6 }
  0x69   : > { %789 = vmatpush.bf16.msra.mxu3 %v1995_v7  ;;  %v1991_v22 = vld [vmem:[#allocation4 + $0xd0] sm:$0xff]  ;;  %v672_v24 = vshrl.u32 %v2523_v19, 16  ;;  %v1978_v25 = vld [vmem:[#allocation4 + $0x88] sm:$0xff]  ;;  %v331_v27 = vrot.slane %v296_v21, 1  ;;  %v1969_v29 = vld [vmem:[#allocation4 + $0x40] sm:$0xff]  ;;  %v675_v31 = vshll.u32 %v2523_v19, 16  ;;  %p2298_p2 = pnand %p2297_p7, %p2444_p4 }
  0x6a   : > { %v1990_v28 = vld [vmem:[#allocation4 + $0xc8] sm:$0xff]  ;;  %v1968_v32 = vld [vmem:[#allocation4 + $0x38] sm:$0xff]  ;;  %v1977_v33 = vld [vmem:[#allocation4 + $0x80] sm:$0xff]  ;;  %p2303_p10 = por %p2302_p6, %p2301_p5 }
  0x6b   : > { %2068 = vmatpush.bf16.msra.mxu1 %v1974_v8  ;;  %437 = vmatpush.bf16.msra.mxu0 %v1974_v8  ;;  %v674_v30 = vrot.slane %v672_v24, 7  ;;  %v332_v34 = vor.u32 %v331_v27, %v293_v26  ;;  %v2004_v35 = vld [vmem:[#allocation4 + $0x138] sm:$0xff]  ;;  %vm2535_vm2 = vmand %vm343_vm0, %vm344_vm1  ;;  %v2539_v38 = vld [vmem:[#allocation2 + $0x10] sm:$0xff]  ;;  %p2299_p3 = pneg %p2298_p2 }
  0x6c   : > { %608 = vmatpush.bf16.msra.mxu2 %v1982_v9  ;;  %v2024_v37 = vld [vmem:[#allocation4 + $0x1b8] sm:$0xff]  ;;  %v1967_v39 = vld [vmem:[#allocation4 + $0x30] sm:$0xff]  ;;  %v1989_v40 = vld [vmem:[#allocation4 + $0xc0] sm:$0xff] }
  0x6d   : > { %790 = vmatpush.bf16.msra.mxu3 %v1994_v10  ;;  %v677_v41 = vor.u32 %v675_v31, %v674_v30  ;;  %v346_v42 = vsel %vm2535_vm2, %v332_v34, 0  ;;  %v2545_v43 = vld [vmem:[#allocation2 + $0x8] sm:$0xff]  ;;  %vm2547_vm5 = vmand %vm324_vm3, %vm325_vm4  ;;  %v2003_v46 = vld [vmem:[#allocation4 + $0x130] sm:$0xff]  ;;  %p2304_p9 = pnand %p2303_p10, %p2299_p3 }
  0x6e   : > { %v2032_v45 = vld [vmem:[#allocation4 + $0x1f8] sm:$0xff]  ;;  %v2023_v47 = vld [vmem:[#allocation4 + $0x1b0] sm:$0xff]  ;;  %v2555_v49 = vld [vmem:[#allocation2 + $0x10] sm:$0xff]  ;;  %v303_v51 = vshll.u32 %v2545_v43, 16  ;;  %v300_v57 = vshrl.u32 %v2545_v43, 16 }
  0x6f   : > { %2069 = vmatpush.bf16.msra.mxu1 %v1973_v11  ;;  %438 = vmatpush.bf16.msra.mxu0 %v1973_v11  ;;  %v703_v48 = vsel %vm2547_vm5, 0, %v677_v41  ;;  %v1966_v50 = vld [vmem:[#allocation4 + $0x28] sm:$0xff]  ;;  %v2031_v52 = vld [vmem:[#allocation4 + $0x1f0] sm:$0xff]  ;;  %v679_v55 = vshrl.u32 %v2555_v49, 16  ;;  %v1965_v56 = vld [vmem:[#allocation4 + $0x20] sm:$0xff]  ;;  %v682_v63 = vshll.u32 %v2555_v49, 16 }
  0x70   : > { %609 = vmatpush.bf16.msra.mxu2 %v1981_v12  ;;  %v2002_v53 = vld [vmem:[#allocation4 + $0x128] sm:$0xff]  ;;  %v333_v58 = vrot.slane %v303_v51, 1  ;;  %v2001_v60 = vld [vmem:[#allocation4 + $0x120] sm:$0xff]  ;;  %v1964_v0 = vld [vmem:[#allocation4 + $0x18] sm:$0xff] }
  0x71   : > { %791 = vmatpush.bf16.msra.mxu3 %v1993_v13  ;;  %v2022_v54 = vld [vmem:[#allocation4 + $0x1a8] sm:$0xff]  ;;  %v2021_v61 = vld [vmem:[#allocation4 + $0x1a0] sm:$0xff]  ;;  %v681_v62 = vrot.slane %v679_v55, 7  ;;  %v2000_v2 = vld [vmem:[#allocation4 + $0x118] sm:$0xff]  ;;  %v310_v13 = vshll.u32 %v2539_v38, 16 }
  0x72   : > { %v2030_v59 = vld [vmem:[#allocation4 + $0x1e8] sm:$0xff]  ;;  %v334_v1 = vor.u32 %v333_v58, %v300_v57  ;;  %v1963_v5 = vld [vmem:[#allocation4 + $0x10] sm:$0xff]  ;;  %v2020_v8 = vld [vmem:[#allocation4 + $0x198] sm:$0xff] }
  0x73   : > { %2070 = vmatpush.bf16.msra.mxu1 %v1972_v14  ;;  %439 = vmatpush.bf16.msra.mxu0 %v1972_v14  ;;  %v2567_v3 = vld [vmem:[#allocation2 + $0x18] sm:$0xff]  ;;  %v684_v4 = vor.u32 %v682_v63, %v681_v62  ;;  %v1999_v7 = vld [vmem:[#allocation4 + $0x110] sm:$0xff]  ;;  %v2029_v9 = vld [vmem:[#allocation4 + $0x1e0] sm:$0xff] }
  0x74   : > { %610 = vmatpush.bf16.msra.mxu2 %v1980_v15  ;;  %v347_v6 = vsel %vm2535_vm2, %v334_v1, 0  ;;  %v2577_v11 = vld [vmem:[#allocation2 + $0x18] sm:$0xff]  ;;  %v2019_v14 = vld [vmem:[#allocation4 + $0x190] sm:$0xff]  ;;  %v2012_v27 = vld [vmem:[#allocation4 + $0x178] sm:$0xff]  ;;  %v314_v58 = vshrl.u32 %v2567_v3, 16 }
  0x75   : > { %792 = vmatpush.bf16.msra.mxu3 %v1992_v17  ;;  %v704_v10 = vsel %vm2547_vm5, 0, %v684_v4  ;;  %v1962_v12 = vld [vmem:[#allocation4 + $0x8] sm:$0xff]  ;;  %v2028_v17 = vld [vmem:[#allocation4 + $0x1d8] sm:$0xff]  ;;  %v2011_v34 = vld [vmem:[#allocation4 + $0x170] sm:$0xff] }
  0x76   : > { %v1998_v15 = vld [vmem:[#allocation4 + $0x108] sm:$0xff]  ;;  %v2027_v41 = vld [vmem:[#allocation4 + $0x1d0] sm:$0xff] }
  0x77   : > { %2071 = vmatpush.bf16.msra.mxu1 %v1971_v18  ;;  %440 = vmatpush.bf16.msra.mxu0 %v1971_v18  ;;  %v295_v18 = vrot.slane %v293_v26, 7  ;;  %v2007_v1 = vld [vmem:[#allocation4 + $0x150] sm:$0xff] }
  0x78   : > { %611 = vmatpush.bf16.msra.mxu2 %v1979_v20  ;;  %v686_v20 = vshrl.u32 %v2577_v11, 16 }
  0x79   : > { %793 = vmatpush.bf16.msra.mxu3 %v1991_v22  ;;  %v1961_v22 = vld [vmem:[#allocation4] sm:$0xff]  ;;  %v298_v30 = vor.u32 %v296_v21, %v295_v18  ;;  %v2039_v21 = vld [vmem:[#allocation4 + $0x230] sm:$0xff] }
  0x7a   : > { %v688_v26 = vrot.slane %v686_v20, 7 }
  0x7b   : > { %2072 = vmatpush.bf16.msra.mxu1 %v1970_v23  ;;  %441 = vmatpush.bf16.msra.mxu0 %v1970_v23  ;;  %v307_v23 = vshrl.u32 %v2539_v38, 16 }
  0x7c   : > { %612 = vmatpush.bf16.msra.mxu2 %v1978_v25  ;;  %v335_v25 = vrot.slane %v310_v13, 1 }
  0x7d   : > { %794 = vmatpush.bf16.msra.mxu3 %v1990_v28  ;;  %v1997_v28 = vld [vmem:[#allocation4 + $0x100] sm:$0xff] }
  0x7f   : > { %2073 = vmatpush.bf16.msra.mxu1 %v1969_v29  ;;  %442 = vmatpush.bf16.msra.mxu0 %v1969_v29  ;;  %v2040_v29 = vld [vmem:[#allocation4 + $0x238] sm:$0xff] }
  0x80   : > { %613 = vmatpush.bf16.msra.mxu2 %v1977_v33  ;;  %v336_v33 = vor.u32 %v335_v25, %v307_v23 }
  0x81   : > { %795 = vmatpush.bf16.msra.mxu3 %v1989_v40  ;;  %v2018_v40 = vld [vmem:[#allocation4 + $0x188] sm:$0xff] }
  0x82   : > { %453 = vmatmul.bf16.vlgmr.msra.gmra.mxu1 %v2539_v38  ;;  %443 = vmatmul.bf16.vlgmr.msra.gmra.mxu0 %v2521_v16  ;;  %v316_v38 = vrot.slane %v314_v58, 7 }
  0x83   : > { %512 = vmatpush.bf16.msrb.mxu1 %v1968_v32  ;;  %894 = vmatpush.bf16.msrb.mxu0 %v2004_v35  ;;  %v689_v32 = vshll.u32 %v2577_v11, 16  ;;  %v327_v35 = vsel %vm2547_vm5, 0, %v298_v30 }
  0x84   : > { %1179 = vmatpush.bf16.msrb.mxu2 %v2024_v37  ;;  %796 = vmatmul.bf16.vlgmr.msra.gmra.mxu3 %v703_v48  ;;  %v348_v37 = vsel %vm2535_vm2, %v336_v33, 0  ;;  %v2017_v48 = vld [vmem:[#allocation4 + $0x180] sm:$0xff] }
  0x85   : > { %614 = vmatmul.bf16.vlgmr.msra.gmra.mxu2 %v346_v42  ;;  %1285 = vmatpush.bf16.msrb.mxu3 %v2032_v45  ;;  %v691_v16 = vor.u32 %v689_v32, %v688_v26  ;;  %v2602_v45 = vld [vmem:[#allocation2 + $0x20] sm:$0xff] }
  0x86   : > { %v696_v62 = vshll.u32 %v2602_v45, 16 }
  0x87   : > { %513 = vmatpush.bf16.msrb.mxu1 %v1967_v39  ;;  %895 = vmatpush.bf16.msrb.mxu0 %v2003_v46  ;;  %v2010_v39 = vld [vmem:[#allocation4 + $0x168] sm:$0xff]  ;;  %v705_v42 = vsel %vm2547_vm5, 0, %v691_v16  ;;  %v2015_v16 = vld [vmem:[#allocation2 + $0x20] sm:$0xff] }
  0x88   : > { %1180 = vmatpush.bf16.msrb.mxu2 %v2023_v47  ;;  %v2038_v46 = vld [vmem:[#allocation4 + $0x228] sm:$0xff]  ;;  %v317_v47 = vshll.u32 %v2567_v3, 16 }
  0x89   : > { %1286 = vmatpush.bf16.msrb.mxu3 %v2031_v52  ;;  %v2009_v52 = vld [vmem:[#allocation4 + $0x160] sm:$0xff] }
  0x8a   : > { %v319_v26 = vor.u32 %v317_v47, %v316_v38 }
  0x8b   : > { %514 = vmatpush.bf16.msrb.mxu1 %v1966_v50  ;;  %896 = vmatpush.bf16.msrb.mxu0 %v2002_v53  ;;  %v2026_v50 = vld [vmem:[#allocation4 + $0x1c8] sm:$0xff]  ;;  %v302_v53 = vrot.slane %v300_v57, 7 }
  0x8c   : > { %1181 = vmatpush.bf16.msrb.mxu2 %v2022_v54  ;;  %v693_v54 = vshrl.u32 %v2602_v45, 16 }
  0x8d   : > { %1287 = vmatpush.bf16.msrb.mxu3 %v2030_v59  ;;  %v337_v59 = vrot.slane %v317_v47, 1 }
  0x8e   : > { %v695_v57 = vrot.slane %v693_v54, 7 }
  0x8f   : > { %515 = vmatpush.bf16.msrb.mxu1 %v1965_v56  ;;  %897 = vmatpush.bf16.msrb.mxu0 %v2001_v60  ;;  %v2037_v56 = vld [vmem:[#allocation4 + $0x220] sm:$0xff]  ;;  %v2008_v60 = vld [vmem:[#allocation4 + $0x158] sm:$0xff] }
  0x90   : > { %1182 = vmatpush.bf16.msrb.mxu2 %v2021_v61  ;;  %v305_v61 = vor.u32 %v303_v51, %v302_v53 }
  0x91   : > { %1288 = vmatpush.bf16.msrb.mxu3 %v2029_v9 }
  0x92   : > { %458 = vmatmul.bf16.gmra.mxu1 %v2567_v3  ;;  %448 = vmatmul.bf16.gmra.mxu0 %v2545_v43  ;;  %v328_v4 = vsel %vm2547_vm5, 0, %v305_v61  ;;  %v698_v43 = vor.u32 %v696_v62, %v695_v57 }
  0x93   : > { %516 = vmatpush.bf16.msrb.mxu1 %v1964_v0  ;;  %898 = vmatpush.bf16.msrb.mxu0 %v2000_v2  ;;  %v338_v0 = vor.u32 %v337_v59, %v314_v58  ;;  %v707_v2 = vrot.slane %v675_v31, 1 }
  0x94   : > { %1183 = vmatpush.bf16.msrb.mxu2 %v2020_v8  ;;  %801 = vmatmul.bf16.gmra.mxu3 %v704_v10  ;;  %v2036_v8 = vld [vmem:[#allocation4 + $0x218] sm:$0xff]  ;;  %v706_v31 = vsel %vm2547_vm5, 0, %v698_v43 }
  0x95   : > { %619 = vmatmul.bf16.gmra.mxu2 %v347_v6  ;;  %1289 = vmatpush.bf16.msrb.mxu3 %v2028_v17  ;;  %v349_v51 = vsel %vm2535_vm2, %v338_v0, 0  ;;  %v2006_v6 = vld [vmem:[#allocation4 + $0x148] sm:$0xff]  ;;  %v708_v9 = vor.u32 %v707_v2, %v672_v24 }
  0x97   : > { %517 = vmatpush.bf16.msrb.mxu1 %v1963_v5  ;;  %899 = vmatpush.bf16.msrb.mxu0 %v1999_v7  ;;  %v2013_v5 = vld [vmem:[#allocation2 + $0x10] sm:$0xff] }
  0x98   : > { %1184 = vmatpush.bf16.msrb.mxu2 %v2019_v14  ;;  %v2025_v7 = vld [vmem:[#allocation4 + $0x1c0] sm:$0xff]  ;;  %v1063_v10 = vshrl.u32 %v2013_v5, 16  ;;  %v1066_v18 = vshll.u32 %v2013_v5, 16 }
  0x99   : > { %1290 = vmatpush.bf16.msrb.mxu3 %v2027_v41  ;;  %v2005_v14 = vld [vmem:[#allocation4 + $0x140] sm:$0xff] }
  0x9a   : > { %v1065_v17 = vrot.slane %v1063_v10, 7 }
  0x9b   : > { %518 = vmatpush.bf16.msrb.mxu1 %v1962_v12  ;;  %900 = vmatpush.bf16.msrb.mxu0 %v1998_v15  ;;  %v2035_v12 = vld [vmem:[#allocation4 + $0x210] sm:$0xff]  ;;  %v309_v15 = vrot.slane %v307_v23, 7  ;;  %v2033_v23 = vld [vmem:[#allocation4 + $0x200] sm:$0xff] }
  0x9c   : > { %1185 = vmatpush.bf16.msrb.mxu2 %v2018_v40  ;;  %v1068_v24 = vor.u32 %v1066_v18, %v1065_v17  ;;  %v1080_v40 = vshll.u32 %v2015_v16, 16 }
  0x9d   : > { %1291 = vmatpush.bf16.msrb.mxu3 %v2026_v50 }
  0x9f   : > { %519 = vmatpush.bf16.msrb.mxu1 %v1961_v22  ;;  %901 = vmatpush.bf16.msrb.mxu0 %v1997_v28  ;;  %v2034_v22 = vld [vmem:[#allocation4 + $0x208] sm:$0xff] }
  0xa0   : > { %1186 = vmatpush.bf16.msrb.mxu2 %v2017_v48  ;;  %v2014_v28 = vld [vmem:[#allocation2 + $0x18] sm:$0xff]  ;;  %v2016_v48 = vld [vmem:[#allocation2 + $0x28] sm:$0xff] }
  0xa1   : > { %1292 = vmatpush.bf16.msrb.mxu3 %v2025_v7  ;;  %v1073_v30 = vshll.u32 %v2014_v28, 16  ;;  %v1084_v50 = vshrl.u32 %v2016_v48, 16  ;;  %v1087_v58 = vshll.u32 %v2016_v48, 16 }
  0xa2   : > { %520 = vmatmul.bf16.vlgmr.msrb.gmra.mxu1 %v327_v35  ;;  %902 = vmatmul.bf16.vlgmr.msrb.gmra.mxu0 %v2523_v19  ;;  %v312_v19 = vor.u32 %v310_v13, %v309_v15 }
  0xa3   : > { %996 = vmatpush.bf16.msra.mxu1 %v2012_v27  ;;  %1387 = vmatpush.bf16.msra.mxu0 %v2040_v29  ;;  %v1094_v27 = vsel %vm2547_vm5, 0, %v1068_v24  ;;  %v1100_v53 = vrot.slane %v1073_v30, 1 }
  0xa4   : > { %806 = vmatmul.bf16.gmra.mxu3 %v705_v42  ;;  %2074 = vmatpush.bf16.msra.mxu2 %v2040_v29  ;;  %v329_v25 = vsel %vm2547_vm5, 0, %v312_v19  ;;  %v1070_v29 = vshrl.u32 %v2014_v28, 16  ;;  %v719_v42 = vsel %vm2535_vm2, %v708_v9, 0 }
  0xa5   : > { %624 = vmatmul.bf16.gmra.mxu2 %v348_v37  ;;  %v1098_v37 = vrot.slane %v1066_v18, 1 }
  0xa6   : > { %v1072_v13 = vrot.slane %v1070_v29, 7 }
  0xa7   : > { %997 = vmatpush.bf16.msra.mxu1 %v2011_v34  ;;  %1388 = vmatpush.bf16.msra.mxu0 %v2039_v21  ;;  %v330_v34 = vsel %vm2547_vm5, 0, %v319_v26  ;;  %v1099_v41 = vor.u32 %v1098_v37, %v1063_v10 }
  0xa8   : > { %2075 = vmatpush.bf16.msra.mxu2 %v2039_v21  ;;  %v1075_v33 = vor.u32 %v1073_v30, %v1072_v13  ;;  %v1077_v21 = vshrl.u32 %v2015_v16, 16 }
  0xaa   : > { %v1095_v35 = vsel %vm2547_vm5, 0, %v1075_v33 }
  0xab   : > { %998 = vmatpush.bf16.msra.mxu1 %v2010_v39  ;;  %1389 = vmatpush.bf16.msra.mxu0 %v2038_v46  ;;  %v1079_v39 = vrot.slane %v1077_v21, 7 }
  0xac   : > { %2076 = vmatpush.bf16.msra.mxu2 %v2038_v46  ;;  %v1110_v46 = vsel %vm2535_vm2, %v1099_v41, 0 }
  0xad   : > { %v1082_v3 = vor.u32 %v1080_v40, %v1079_v39 }
  0xaf   : > { %999 = vmatpush.bf16.msra.mxu1 %v2009_v52  ;;  %1390 = vmatpush.bf16.msra.mxu0 %v2037_v56  ;;  %v1096_v47 = vsel %vm2547_vm5, 0, %v1082_v3  ;;  %v709_v52 = vrot.slane %v682_v63, 1  ;;  %v711_v63 = vrot.slane %v689_v32, 1 }
  0xb0   : > { %2077 = vmatpush.bf16.msra.mxu2 %v2037_v56  ;;  %v1086_v56 = vrot.slane %v1084_v50, 7 }
  0xb1   : > { %v710_v59 = vor.u32 %v709_v52, %v679_v55  ;;  %v1104_v55 = vrot.slane %v1087_v58, 1  ;;  %v712_v2 = vor.u32 %v711_v63, %v686_v20  ;;  %v713_v20 = vrot.slane %v696_v62, 1 }
  0xb2   : > { %525 = vmatmul.bf16.gmra.mxu1 %v328_v4  ;;  %907 = vmatmul.bf16.gmra.mxu0 %v2555_v49  ;;  %v1089_v61 = vor.u32 %v1087_v58, %v1086_v56  ;;  %v1102_v49 = vrot.slane %v1080_v40, 1 }
  0xb3   : > { %1000 = vmatpush.bf16.msra.mxu1 %v2008_v60  ;;  %1391 = vmatpush.bf16.msra.mxu0 %v2036_v8  ;;  %v1101_v60 = vor.u32 %v1100_v53, %v1070_v29  ;;  %v720_v57 = vsel %vm2535_vm2, %v710_v59, 0  ;;  %v1105_v43 = vor.u32 %v1104_v55, %v1084_v50  ;;  %v714_v9 = vor.u32 %v713_v20, %v693_v54 }
  0xb4   : > { %811 = vmatmul.bf16.gmra.mxu3 %v706_v31  ;;  %2078 = vmatpush.bf16.msra.mxu2 %v2036_v8  ;;  %v1103_v4 = vor.u32 %v1102_v49, %v1077_v21 }
  0xb5   : > { %629 = vmatmul.bf16.gmra.mxu2 %v349_v51  ;;  %v1111_v0 = vsel %vm2535_vm2, %v1101_v60, 0  ;;  %v1113_v7 = vsel %vm2535_vm2, %v1105_v43, 0 }
  0xb7   : > { %1001 = vmatpush.bf16.msra.mxu1 %v2007_v1  ;;  %1392 = vmatpush.bf16.msra.mxu0 %v2035_v12  ;;  %v1097_v1 = vsel %vm2547_vm5, 0, %v1089_v61 }
  0xb8   : > { %2079 = vmatpush.bf16.msra.mxu2 %v2035_v12 }
  0xbb   : > { %1002 = vmatpush.bf16.msra.mxu1 %v2006_v6  ;;  %1393 = vmatpush.bf16.msra.mxu0 %v2034_v22  ;;  %v1112_v6 = vsel %vm2535_vm2, %v1103_v4, 0 }
  0xbc   : > { %2080 = vmatpush.bf16.msra.mxu2 %v2034_v22 }
  0xbf   : > { %1003 = vmatpush.bf16.msra.mxu1 %v2005_v14  ;;  %1394 = vmatpush.bf16.msra.mxu0 %v2033_v23  ;;  %v722_v14 = vsel %vm2535_vm2, %v714_v9, 0 }
  0xc0   : > { %2081 = vmatpush.bf16.msra.mxu2 %v2033_v23 }
  0xc2   : > { %530 = vmatmul.bf16.gmra.mxu1 %v329_v25  ;;  %912 = vmatmul.bf16.gmra.mxu0 %v2577_v11 }
  0xc4   : > { %1293 = vmatmul.bf16.vlgmr.msrb.gmra.mxu3 %v2013_v5  ;;  %v721_v5 = vsel %vm2535_vm2, %v712_v2, 0 }
  0xc5   : > { %1187 = vmatmul.bf16.vlgmr.msrb.gmra.mxu2 %v1094_v27 }
  0xd2   : > { %535 = vmatmul.bf16.gmra.mxu1 %v330_v34  ;;  %917 = vmatmul.bf16.gmra.mxu0 %v2602_v45 }
  0xd4   : > { %1298 = vmatmul.bf16.gmra.mxu3 %v2014_v28 }
  0xd5   : > { %1192 = vmatmul.bf16.gmra.mxu2 %v1095_v35 }
  0xe2   : > { %1004 = vmatmul.bf16.vlgmr.msra.gmra.mxu1 %v719_v42  ;;  %1395 = vmatmul.bf16.vlgmr.msra.gmra.mxu0 %v1110_v46 }
  0xe4   : > { %1303 = vmatmul.bf16.gmra.mxu3 %v2015_v16 }
  0xe5   : > { %1197 = vmatmul.bf16.gmra.mxu2 %v1096_v47 }
  0xf2   : > { %1009 = vmatmul.bf16.gmra.mxu1 %v720_v57  ;;  %1400 = vmatmul.bf16.gmra.mxu0 %v1111_v0 }
  0xf4   : > { %1308 = vmatmul.bf16.gmra.mxu3 %v2016_v48 }
  0xf5   : > { %1202 = vmatmul.bf16.gmra.mxu2 %v1097_v1 }
  0xff   : > { %v454_v51 = vpop.f32.mrf.mxu1  ;;  %v444_v44 = vpop.f32.mrf.mxu0 }
 0x102   : > { %1014 = vmatmul.bf16.gmra.mxu1 %v721_v5  ;;  %1405 = vmatmul.bf16.gmra.mxu0 %v1112_v6 }
 0x105   : > { %1410 = vmatmul.bf16.vlgmr.msra.gmra.mxu2 %v1113_v7 }
 0x107   : > { %v456_v8 = vpop.f32.mrf.mxu1  ;;  %v446_v11 = vpop.f32.mrf.mxu0 }
 0x108   : > { %v615_v32 = vpop.f32.mrf.mxu2  ;;  %v797_v31 = vpop.f32.mrf.mxu3 }
 0x10f   : > { %v459_v12 = vpop.f32.mrf.mxu1  ;;  %v449_v15 = vpop.f32.mrf.mxu0 }
 0x110   : > { %v617_v10 = vpop.f32.mrf.mxu2  ;;  %v2677_v17 = vpop.f32.mrf.mxu3 }
 0x112   : > { %1019 = vmatmul.bf16.gmra.mxu1 %v722_v14 }
 0x117   : > { %v461_v22 = vpop.f32.mrf.mxu1  ;;  %v451_v19 = vpop.f32.mrf.mxu0 }
 0x118   : > { %v620_v18 = vpop.f32.mrf.mxu2  ;;  %v802_v24 = vpop.f32.mrf.mxu3 }
 0x11f   : > { %v521_v27 = vpop.f32.mrf.mxu1  ;;  %v903_v62 = vpop.f32.mrf.mxu0 }
 0x120   : > { %v622_v25 = vpop.f32.mrf.mxu2  ;;  %v522_v28 = vadd.f32 %v521_v27, %v444_v44  ;;  %v2679_v45 = vpop.f32.mrf.mxu3 }
 0x122   : > { %v635_v23 = vadd.f32 %v615_v32, %v522_v28 }
 0x124   : > { %v817_v54 = vadd.f32 %v797_v31, %v635_v23 }
 0x126   : > { %v923_v29 = vadd.f32 %v903_v62, %v817_v54 }
 0x127   : > { %v523_v36 = vpop.f32.mrf.mxu1  ;;  %v905_v13 = vpop.f32.mrf.mxu0 }
 0x128   : > { %v625_v38 = vpop.f32.mrf.mxu2  ;;  %v524_v30 = vadd.f32 %v523_v36, %v446_v11  ;;  %v807_v33 = vpop.f32.mrf.mxu3 }
 0x12a   : > { %v636_v26 = vadd.f32 %v617_v10, %v524_v30 }
 0x12f   : > { %v526_v35 = vpop.f32.mrf.mxu1  ;;  %v908_v16 = vpop.f32.mrf.mxu0 }
 0x130   : > { %v627_v34 = vpop.f32.mrf.mxu2  ;;  %v527_v21 = vadd.f32 %v526_v35, %v449_v15  ;;  %v2681_v3 = vpop.f32.mrf.mxu3 }
 0x132   : > { %v637_v37 = vadd.f32 %v620_v18, %v527_v21 }
 0x134   : > { %v819_v39 = vadd.f32 %v802_v24, %v637_v37 }
 0x136   : > { %v925_v40 = vadd.f32 %v908_v16, %v819_v39 }
 0x137   : > { %v528_v42 = vpop.f32.mrf.mxu1  ;;  %v910_v46 = vpop.f32.mrf.mxu0 }
 0x138   : > { %v630_v41 = vpop.f32.mrf.mxu2  ;;  %v529_v47 = vadd.f32 %v528_v42, %v451_v19  ;;  %v812_v58 = vpop.f32.mrf.mxu3  ;;  %v818_v19 = vadd.f32 %v2677_v17, %v636_v26 }
 0x13a   : > { %v638_v48 = vadd.f32 %v622_v25, %v529_v47  ;;  %v924_v24 = vadd.f32 %v905_v13, %v818_v19 }
 0x13c   : > { %v820_v35 = vadd.f32 %v2679_v45, %v638_v48 }
 0x13e   : > { %v926_v47 = vadd.f32 %v910_v46, %v820_v35 }
 0x13f   : > { %v531_v52 = vpop.f32.mrf.mxu1  ;;  %v913_v53 = vpop.f32.mrf.mxu0 }
 0x140   : > { %v632_v50 = vpop.f32.mrf.mxu2  ;;  %v532_v56 = vadd.f32 %v531_v52, %v454_v51  ;;  %v2689_v55 = vpop.f32.mrf.mxu3 }
 0x142   : > { %v639_v59 = vadd.f32 %v625_v38, %v532_v56 }
 0x144   : > { %v821_v60 = vadd.f32 %v807_v33, %v639_v59 }
 0x146   : > { %v2683_v61 = vadd.f32 %v913_v53, %v821_v60 }
 0x147   : > { %v533_v0 = vpop.f32.mrf.mxu1  ;;  %v2685_v1 = vpop.f32.mrf.mxu0 }
 0x148   : > { %v1188_v57 = vpop.f32.mrf.mxu2  ;;  %v534_v63 = vadd.f32 %v533_v0, %v456_v8  ;;  %v1294_v6 = vpop.f32.mrf.mxu3 }
 0x14a   : > { %v2687_v49 = vadd.f32 %v627_v34, %v534_v63 }
 0x14f   : > { %v536_v4 = vpop.f32.mrf.mxu1  ;;  %v918_v43 = vpop.f32.mrf.mxu0 }
 0x150   : > { %v1190_v2 = vpop.f32.mrf.mxu2  ;;  %v537_v5 = vadd.f32 %v536_v4, %v459_v12  ;;  %v1296_v8 = vpop.f32.mrf.mxu3  ;;  %v822_v4 = vadd.f32 %v2681_v3, %v2687_v49 }
 0x152   : > { %v641_v44 = vadd.f32 %v630_v41, %v537_v5 }
 0x154   : > { %v823_v51 = vadd.f32 %v812_v58, %v641_v44 }
 0x156   : > { %v2691_v7 = vadd.f32 %v918_v43, %v823_v51 }
 0x157   : > { %v538_v11 = vpop.f32.mrf.mxu1  ;;  %v2693_v20 = vpop.f32.mrf.mxu0 }
 0x158   : > { %v1193_v32 = vpop.f32.mrf.mxu2  ;;  %v539_v31 = vadd.f32 %v538_v11, %v461_v22  ;;  %v1299_v23 = vpop.f32.mrf.mxu3  ;;  %v2701_v22 = vld [vmem:[%s2766_s2] ss:$0 sm:$0xff] }
 0x15a   : > { %v2695_v9 = vadd.f32 %v632_v50, %v539_v31 }
 0x15f   : > { %v1005_v10 = vpop.f32.mrf.mxu1  ;;  %v1396_v14 = vpop.f32.mrf.mxu0 }
 0x160   : > { %v1025_v15 = vadd.f32 %v1005_v10, %v923_v29  ;;  %v1195_v18 = vpop.f32.mrf.mxu2  ;;  %v1301_v39 = vpop.f32.mrf.mxu3 }
 0x162   : > { %v1208_v12 = vadd.f32 %v1188_v57, %v1025_v15 }
 0x164   : > { %v1314_v25 = vadd.f32 %v1294_v6, %v1208_v12  ;;  %v928_v6 = vadd.f32 %v2685_v1, %v822_v4 }
 0x166   : > { %v1416_v54 = vadd.f32 %v1396_v14, %v1314_v25  ;;  %v824_v25 = vadd.f32 %v2689_v55, %v2695_v9 }
 0x167   : > { %v1007_v27 = vpop.f32.mrf.mxu1  ;;  %v1398_v62 = vpop.f32.mrf.mxu0 }
 0x168   : > { %v1026_v28 = vadd.f32 %v1007_v27, %v924_v24  ;;  %v1198_v36 = vpop.f32.mrf.mxu2  ;;  %v1428_v30 = vadd.f32 %v2701_v22, %v1416_v54  ;;  %v1304_v57 = vpop.f32.mrf.mxu3 }
 0x16a   : > { %v1209_v38 = vadd.f32 %v1190_v2, %v1026_v28  ;;  %v1436_v16 = vmax.f32 %v1428_v30, 0.0 }
 0x16c   : > { %v1315_v29 = vadd.f32 %v1296_v8, %v1209_v38  ;;  %v930_v38 = vadd.f32 %v2693_v20, %v824_v25 }
 0x16e   : > { %v1417_v17 = vadd.f32 %v1398_v62, %v1315_v29 }
 0x16f   : > { %v1010_v26 = vpop.f32.mrf.mxu1  ;;  %v1401_v13 = vpop.f32.mrf.mxu0 }
 0x170   : > { %v1429_v33 = vadd.f32 %v2701_v22, %v1417_v17  ;;  %v1027_v34 = vadd.f32 %v1010_v26, %v925_v40  ;;  %v1200_v42 = vpop.f32.mrf.mxu2  ;;  %v1306_v11 = vpop.f32.mrf.mxu3 }
 0x172   : > { %v1437_v21 = vmax.f32 %v1429_v33, 0.0  ;;  %v1210_v37 = vadd.f32 %v1193_v32, %v1027_v34 }
 0x174   : > { %v2046_v41 = vpack.c.bf16 %v1437_v21, %v1436_v16  ;;  %v1316_v50 = vadd.f32 %v1299_v23, %v1210_v37 }
 0x176   : > { %2047 = vst [vmem:[%s2509_s11] sm:$0xff] %v2046_v41   ;;  %v1418_v58 = vadd.f32 %v1401_v13, %v1316_v50 }
 0x177   : > { %v1012_v52 = vpop.f32.mrf.mxu1  ;;  %v1403_v53 = vpop.f32.mrf.mxu0 }
 0x178   : > { %v1028_v56 = vadd.f32 %v1012_v52, %v926_v47  ;;  %v1430_v40 = vadd.f32 %v2701_v22, %v1418_v58  ;;  %v1203_v48 = vpop.f32.mrf.mxu2  ;;  %v1309_v1 = vpop.f32.mrf.mxu3 }
 0x17a   : > { %v1211_v59 = vadd.f32 %v1195_v18, %v1028_v56  ;;  %v1438_v43 = vmax.f32 %v1430_v40, 0.0 }
 0x17c   : > { %v1317_v60 = vadd.f32 %v1301_v39, %v1211_v59 }
 0x17e   : > { %v1419_v45 = vadd.f32 %v1403_v53, %v1317_v60 }
 0x17f   : > { %v1015_v0 = vpop.f32.mrf.mxu1  ;;  %v1406_v46 = vpop.f32.mrf.mxu0 }
 0x180   : > { %v1431_v63 = vadd.f32 %v2701_v22, %v1419_v45  ;;  %v1029_v2 = vadd.f32 %v1015_v0, %v2683_v61  ;;  %v1205_v10 = vpop.f32.mrf.mxu2  ;;  %v1311_v26 = vpop.f32.mrf.mxu3 }
 0x182   : > { %v1439_v5 = vmax.f32 %v1431_v63, 0.0  ;;  %v1212_v44 = vadd.f32 %v1198_v36, %v1029_v2 }
 0x184   : > { %v2051_v51 = vpack.c.bf16 %v1439_v5, %v1438_v43  ;;  %v1318_v32 = vadd.f32 %v1304_v57, %v1212_v44 }
 0x186   : > { %2063 = vst [vmem:[%s2509_s11 + $0x8] sm:$0xff] %v2051_v51   ;;  %v1420_v14 = vadd.f32 %v1406_v46, %v1318_v32 }
 0x187   : > { %v1017_v31 = vpop.f32.mrf.mxu1  ;;  %v1408_v61 = vpop.f32.mrf.mxu0 }
 0x188   : > { %v1030_v8 = vadd.f32 %v1017_v31, %v928_v6  ;;  %v1432_v19 = vadd.f32 %v2701_v22, %v1420_v14  ;;  %v1411_v23 = vpop.f32.mrf.mxu2 }
 0x18a   : > { %v1213_v15 = vadd.f32 %v1200_v42, %v1030_v8  ;;  %v1440_v27 = vmax.f32 %v1432_v19, 0.0 }
 0x18c   : > { %v1319_v18 = vadd.f32 %v1306_v11, %v1213_v15 }
 0x18e   : > { %v1421_v3 = vadd.f32 %v1408_v61, %v1319_v18 }
 0x18f   : > { %v1020_v49 = vpop.f32.mrf.mxu1 }
 0x190   : > { %v1433_v12 = vadd.f32 %v2701_v22, %v1421_v3  ;;  %v1031_v24 = vadd.f32 %v1020_v49, %v2691_v7  ;;  %v1413_v55 = vpop.f32.mrf.mxu2 }
 0x192   : > { %v1441_v62 = vmax.f32 %v1433_v12, 0.0  ;;  %v1214_v28 = vadd.f32 %v1203_v48, %v1031_v24 }
 0x194   : > { %v2056_v54 = vpack.c.bf16 %v1441_v62, %v1440_v27  ;;  %v1320_v36 = vadd.f32 %v1309_v1, %v1214_v28 }
 0x196   : > { %2064 = vst [vmem:[%s2509_s11 + $0x10] sm:$0xff] %v2056_v54   ;;  %v1422_v17 = vadd.f32 %v1411_v23, %v1320_v36 }
 0x197   : > { %v1022_v29 = vpop.f32.mrf.mxu1 }
 0x198   : > { %v1032_v30 = vadd.f32 %v1022_v29, %v930_v38  ;;  %v1434_v9 = vadd.f32 %v2701_v22, %v1422_v17 }
 0x19a   : > { %v1215_v7 = vadd.f32 %v1205_v10, %v1032_v30  ;;  %v1442_v34 = vmax.f32 %v1434_v9, 0.0 }
 0x19c   : > { %v1321_v13 = vadd.f32 %v1311_v26, %v1215_v7 }
 0x19e   : > { %v1423_v20 = vadd.f32 %v1413_v55, %v1321_v13 }
 0x1a0   : > { %v1435_v33 = vadd.f32 %v2701_v22, %v1423_v20 }
 0x1a2   : > { %v1443_v35 = vmax.f32 %v1435_v33, 0.0 }
 0x1a4   : > { %v2061_v16 = vpack.c.bf16 %v1443_v35, %v1442_v34 }
 0x1a6   : > { %2065 = vst [vmem:[%s2509_s11 + $0x18] sm:$0xff] %v2061_v16  }
 0x1a7   : > { %2307 = shalt.err (!%p2304_p9)
}
 0x1a8   : > { %s2382_s28 = smov 64   ;;  %s2383_s11 = smov 4  }
 0x1a9   : > { %2094 = dma.vmem_to_hbm [thread:$0]  (%p2444_p4), %s1477_s26, 512, %s1479_s9, %s1461_s15, %s2382_s28, %s2382_s28, %s2383_s11  }
 0x1aa PF: > { %p2110_p11 = scmp.ge.s32.totalorder %s2372_s17, 2  ;;  %s1493_s8 = sand.u32 1, %s2352_s12  }
 0x1ab   : > { %s1494_s4 = scalar_lea.sflag [#allocation6], %s1493_s8 }
 0x1ac   : > { %p2101_p12 = pnand %p2110_p11, %p2451_p8 }
 0x1ae   : > { %p2102_p13 = pneg %p2101_p12 }
 0x1b0   : > { %2347 = dma.done.wait (%p2102_p13), %s1494_s4, 512  }
 0x1b1   : > { %2349 = vsyncadd (%p2102_p13), %s1494_s4, 4294966784  ;;  %s17_s17 = sadd.s32 1, %s2372_s17   ;;  %s2776_s12 = smov %s2356_s13 }
 0x1b2   : > { %p14_p0 = scmp.ge.s32.totalorder %s17_s17, 6   ;;  %s2777_s13 = smov %s2360_s14 }
 0x1b3   : > { %s2778_s14 = smov %s2457_s25  ;;  %s2779_s15 = smov %s2368_s16 }
 0x1b4   : > { %s2780_s16 = smov %s2782_s20  ;;  %16 = sbr.rel (!%p14_p0) target bundleno = 5 (0x5), region = 122 }
 0x1b9   :  { %1500 = vsyncpa [#allocation5], 1 }
 0x1ba   :  { %1502 = vsyncpa [#allocation5 + $0x1], 1 }
 0x1bb   :  { %1503 = vsyncpa [#allocation6], 1 }
 0x1bc   :  { %1505 = vsyncpa [#allocation6 + $0x1], 1 }
 0x1bd   :  { %1506 = vsyncmov [#allocation3] }
 0x1c0   :  { %s1507_s22 = vpop.sfrf %1506 }
 0x1c1   :  { %p1950_p4 = scmp.ne.s32.totalorder %s1507_s22, 0 }
 0x1c3   :  { %1511 = shalt.err (%p1950_p4)  }
 0x1c4   :  { %1513 = vsyncmov [#allocation3 + $0x1] }
 0x1c7   :  { %s1514_s24 = vpop.sfrf %1513 }
 0x1c8   :  { %p1951_p8 = scmp.ne.s32.totalorder %s1514_s24, 0 }
 0x1ca   :  { %1518 = shalt.err (%p1951_p8)  }
 0x1cb   :  { %1520 = vsyncmov [#allocation3 + $0x2] }
 0x1ce   :  { %s1521_s25 = vpop.sfrf %1520 }
 0x1cf   :  { %p1952_p1 = scmp.ne.s32.totalorder %s1521_s25, 0 }
 0x1d1   :  { %1525 = shalt.err (%p1952_p1)  }

</bundles_post_ra>
